<compile_context>
chip_gen: v7x
topology: tpu7x:2x2x1
jax: 0.10.0
libtpu: 0.0.40
codegen_flags: <defaults>
</compile_context>

<pallas_src>
import jax
import jax.numpy as jnp
import numpy as np
from jax.experimental import pallas as pl
from jax.experimental.pallas import tpu as pltpu

EPS = 1e-5
LANE = 128
_TARGET_M = 512                       # target matmul rows per grid step
_VMEM_STEP_BUDGET = 24 * 1024 * 1024  # rough per-step activation budget


def _round_up(x, m):
    return ((x + m - 1) // m) * m


def _pad_last(a, target):
    pad = target - a.shape[-1]
    if pad == 0:
        return a
    return jnp.pad(a, [(0, 0)] * (a.ndim - 1) + [(0, pad)])


def _fold_bn(gamma, beta, mean, var):
    # inference-mode BatchNorm folded into a per-channel affine (scale, bias).
    inv = 1.0 / jnp.sqrt(var + EPS)
    scale = gamma * inv
    bias = beta - mean * scale
    return scale, bias


def _tap_weights(w_oihw, cpi, cpo):
    # (Cout, Cin, 3, 3) -> (9, Cpi, Cpo); tap index t = kh*3 + kw.
    cout, cin, kh, kw = w_oihw.shape
    w = jnp.transpose(w_oihw, (2, 3, 1, 0))  # (kh, kw, cin, cout)
    w = jnp.pad(w, ((0, 0), (0, 0), (0, cpi - cin), (0, cpo - cout)))
    return w.reshape(kh * kw, cpi, cpo)


# --------------------------- capability probes --------------------------------

_VMEM_LIMIT = None


def _vmem_limit_bytes():
    """Generation-aware scoped-VMEM limit: ~3/4 of physical, capped at 96 MB."""
    global _VMEM_LIMIT
    if _VMEM_LIMIT is None:
        cap = 64 * 1024 * 1024
        try:
            info = pltpu.get_tpu_info()
            cap = int(getattr(info, "vmem_capacity_bytes", cap))
        except Exception:
            pass
        _VMEM_LIMIT = min((cap * 3) // 4, 96 * 1024 * 1024)
    return _VMEM_LIMIT


_BUFFERED1_OK = None


def _single_buffer_supported():
    """Probe once whether pipeline_mode=pl.Buffered(1) compiles and runs."""
    global _BUFFERED1_OK
    if _BUFFERED1_OK is None:
        try:
            def k(x_ref, o_ref):
                o_ref[...] = x_ref[...]

            f = pl.pallas_call(
                k,
                grid=(2,),
                in_specs=[pl.BlockSpec((8, 128), lambda i: (0, 0),
                                       pipeline_mode=pl.Buffered(1))],
                out_specs=pl.BlockSpec((8, 128), lambda i: (0, 0)),
                out_shape=jax.ShapeDtypeStruct((8, 128), jnp.float32),
            )
            jax.block_until_ready(f(jnp.zeros((8, 128), jnp.float32)))
            _BUFFERED1_OK = True
        except Exception:
            _BUFFERED1_OK = False
    return _BUFFERED1_OK


def _const_spec(shape):
    """BlockSpec for a grid-invariant operand; single-buffered when supported."""
    nd = len(shape)
    imap = lambda i: (0,) * nd  # noqa: E731
    if _single_buffer_supported():
        return pl.BlockSpec(shape, imap, pipeline_mode=pl.Buffered(1))
    return pl.BlockSpec(shape, imap)


# ------------------------------ Pallas kernel ---------------------------------

def _make_conv_kernel(*, stride, nb, ho, wo, cpi, cpo, compute_dtype,
                      fuse_shortcut_proj, fuse_residual_add):
    """Fused [BN affine + ReLU] -> stride-s 3x3 conv (+bias) kernel.

    `nb` images per grid step.  The input block is the image batch reshaped
    (free, row-major) into stride phases (nb, Ho, s, Wo, s*Cpi) so every 3x3
    tap of the *strided* conv is an aligned slice of one phase plane.  Each tap
    is an accumulated MXU matmul (K = Cpi) of the shifted phase against that
    tap's weight slice; conv zero padding is a hoisted zero row/column block
    concatenated in (no big im2col scratch, no masked border stores).
    Optional fused epilogues: 1x1 stride-s shortcut projection of the raw input
    (second output) and the residual add.
    """
    s = stride
    p_out = ho * wo
    m_tot = nb * p_out

    def kernel(*refs):
        it = iter(refs)
        x_ref = next(it)
        scale_ref = next(it)
        bias_ref = next(it)
        w_ref = next(it)
        b_ref = next(it)
        wsc_ref = next(it) if fuse_shortcut_proj else None
        bsc_ref = next(it) if fuse_shortcut_proj else None
        resid_ref = next(it) if fuse_residual_add else None
        out_ref = next(it)
        sc_ref = next(it) if fuse_shortcut_proj else None

        scale = scale_ref[...].reshape(1, 1, 1, cpi).astype(jnp.float32)
        bias = bias_ref[...].reshape(1, 1, 1, cpi).astype(jnp.float32)

        # Fused BN + ReLU per stride phase (phase (p, q) holds input pixels
        # (s*i + p, s*j + q)); computed once, reused by the taps that need it.
        # The phase slice is lane-aligned (cpi multiple of 128) -> no relayout.
        a_phase = [[None] * s for _ in range(s)]
        for p in range(s):
            for q in range(s):
                xpq = x_ref[:, :, p, :, q * cpi:(q + 1) * cpi].astype(jnp.float32)
                a_phase[p][q] = jnp.maximum(xpq * scale + bias,
                                            0.0).astype(compute_dtype)

        # Hoisted zero blocks for the conv's zero padding (JAX does not CSE
        # broadcasts: create once, reuse for every tap).
        zero_row = jnp.zeros((nb, 1, wo, cpi), compute_dtype)
        zero_col = jnp.zeros((nb, ho, 1, cpi), compute_dtype)

        def shifted(a, dr, dc):
            if dr == -1:
                a = jnp.concatenate([zero_row, a[:, :ho - 1]], axis=1)
            elif dr == 1:
                a = jnp.concatenate([a[:, 1:], zero_row], axis=1)
            if dc == -1:
                a = jnp.concatenate([zero_col, a[:, :, :wo - 1]], axis=2)
            elif dc == 1:
                a = jnp.concatenate([a[:, :, 1:], zero_col], axis=2)
            return a

        # 9 accumulated MXU matmuls, f32 accumulation, lane-dense output slab.
        acc = None
        for kh in range(3):
            for kw in range(3):
                t = kh * 3 + kw
                p, q = (kh - 1) % s, (kw - 1) % s
                dr, dc = (kh - 1) // s, (kw - 1) // s
                src = shifted(a_phase[p][q], dr, dc).reshape(m_tot, cpi)
                term = jnp.dot(src, w_ref[t],
                               preferred_element_type=jnp.float32)
                acc = term if acc is None else acc + term

        acc = acc + b_ref[...].astype(jnp.float32)
        if fuse_residual_add:
            acc = acc + resid_ref[...].astype(jnp.float32).reshape(m_tot, cpo)
        out_ref[...] = acc.reshape(nb, p_out, cpo).astype(out_ref.dtype)

        if fuse_shortcut_proj:
            # 1x1 stride-s conv of the *raw* input (= phase (0, 0)), fused here
            # so the residual add in the second conv needs no extra HBM pass.
            xc = x_ref[:, :, 0, :, 0:cpi].reshape(m_tot, cpi)
            sc = jnp.dot(xc, wsc_ref[...], preferred_element_type=jnp.float32)
            sc = sc + bsc_ref[...].astype(jnp.float32)
            sc_ref[...] = sc.reshape(nb, p_out, cpo).astype(sc_ref.dtype)

    return kernel


def _pick_batch_block(n, p_out, h, w_sp, cpi, cpo, itemsize, n_io):
    # Batch images per grid step so the matmul M-dim (n_blk * p_out) keeps the
    # 256-tall v6e/v7x MXU busy, bounded by a rough double-buffered VMEM budget.
    n_blk = max(1, min(n, (_TARGET_M + p_out - 1) // p_out))

    def step_bytes(nb):
        return 2 * nb * (h * w_sp * cpi + n_io * p_out * cpo) * itemsize

    while n_blk > 1 and step_bytes(n_blk) > _VMEM_STEP_BUDGET:
        n_blk -= 1
    while n % n_blk:
        n_blk -= 1
    return n_blk


def _conv3x3_call(x_nhwc, scale, bias, w_taps, b, *, stride, cpi, cpo,
                  compute_dtype, out_dtype, shortcut=None, resid=None):
    n, h, w_sp, _ = x_nhwc.shape
    s = stride
    ho, wo = h // s, w_sp // s
    p_out = ho * wo

    fuse_proj = shortcut is not None
    fuse_res = resid is not None
    n_io = 1 + int(fuse_proj) + int(fuse_res)

    n_blk = _pick_batch_block(n, p_out, h, w_sp, cpi, cpo,
                              jnp.dtype(compute_dtype).itemsize, n_io)
    grid = (n // n_blk,)

    x_ph = x_nhwc.reshape(n, ho, s, wo, s * cpi)  # free row-major phase reshape

    kernel = _make_conv_kernel(stride=s, nb=n_blk, ho=ho, wo=wo, cpi=cpi,
                               cpo=cpo, compute_dtype=compute_dtype,
                               fuse_shortcut_proj=fuse_proj,
                               fuse_residual_add=fuse_res)

    in_specs = [
        pl.BlockSpec((n_blk, ho, s, wo, s * cpi), lambda i: (i, 0, 0, 0, 0)),
        _const_spec((1, cpi)),            # BN scale
        _const_spec((1, cpi)),            # BN bias
        _const_spec((9, cpi, cpo)),       # per-tap conv weights
        _const_spec((1, cpo)),            # conv bias
    ]
    args = [x_ph, scale, bias, w_taps, b]
    if fuse_proj:
        wsc, bsc = shortcut
        in_specs += [_const_spec((cpi, cpo)), _const_spec((1, cpo))]
        args += [wsc, bsc]
    if fuse_res:
        in_specs.append(pl.BlockSpec((n_blk, p_out, cpo), lambda i: (i, 0, 0)))
        args.append(resid)

    out_shape = [jax.ShapeDtypeStruct((n, p_out, cpo), out_dtype)]
    out_specs = [pl.BlockSpec((n_blk, p_out, cpo), lambda i: (i, 0, 0))]
    if fuse_proj:
        out_shape.append(jax.ShapeDtypeStruct((n, p_out, cpo), out_dtype))
        out_specs.append(pl.BlockSpec((n_blk, p_out, cpo), lambda i: (i, 0, 0)))

    # TODO(synk): for N==1 inference on v7x add a second "parallel" grid axis
    # over output-row tiles (1-row halo) so both TensorCores get work.
    grid_spec = pltpu.PrefetchScalarGridSpec(
        num_scalar_prefetch=0,
        grid=grid,
        in_specs=in_specs,
        out_specs=out_specs,
    )
    return pl.pallas_call(
        kernel,
        grid_spec=grid_spec,
        out_shape=out_shape,
        compiler_params=pltpu.CompilerParams(
            dimension_semantics=("parallel",),
            vmem_limit_bytes=_vmem_limit_bytes(),
        ),
    )(*args)


# ------------------------------- block wrapper --------------------------------

def wide_basic_forward(x_nchw, params, stride, *, compute_dtype=jnp.bfloat16,
                       out_dtype=None):
    """WideBasic block forward.  Returns NCHW in `out_dtype` (default: the
    compute dtype, so chained blocks keep half-width HBM traffic; cast to f32
    at the true model boundary)."""
    if out_dtype is None:
        out_dtype = compute_dtype
    n, cin, h, w_sp = x_nchw.shape
    cout = params["conv1_w"].shape[0]
    s = stride
    assert h % s == 0 and w_sp % s == 0
    # TODO(synk): the low-channel stem (cin=16) could pad only to the sublane
    # quantum and use a deep-K matmul instead of 128-lane padding.
    cpi = _round_up(cin, LANE)
    cpo = _round_up(cout, LANE)
    ho, wo = h // s, w_sp // s
    identity_sc = (cin == cout and s == 1)

    # One-time layout plumbing.  In a full network, activations stay in
    # channel-padded NHWC (compute dtype) between blocks; the transpose /
    # channel pad / slice happen once at the model boundary, not per block.
    x = jnp.transpose(x_nchw, (0, 2, 3, 1))
    x = _pad_last(x, cpi).astype(compute_dtype)

    scale1, bias1 = _fold_bn(*params["bn1"])
    scale1 = _pad_last(scale1, cpi).reshape(1, cpi).astype(jnp.float32)
    bias1 = _pad_last(bias1, cpi).reshape(1, cpi).astype(jnp.float32)
    scale2, bias2 = _fold_bn(*params["bn2"])
    scale2 = _pad_last(scale2, cpo).reshape(1, cpo).astype(jnp.float32)
    bias2 = _pad_last(bias2, cpo).reshape(1, cpo).astype(jnp.float32)

    w1 = _tap_weights(params["conv1_w"], cpi, cpo).astype(compute_dtype)
    b1 = _pad_last(params["conv1_b"], cpo).reshape(1, cpo).astype(jnp.float32)
    w2 = _tap_weights(params["conv2_w"], cpo, cpo).astype(compute_dtype)
    b2 = _pad_last(params["conv2_b"], cpo).reshape(1, cpo).astype(jnp.float32)

    if identity_sc:
        shortcut = None
    else:
        wsc = jnp.pad(params["shortcut_w"],
                      ((0, cpi - cin), (0, cpo - cout))).astype(compute_dtype)
        bsc = _pad_last(params["shortcut_b"], cpo).reshape(1, cpo).astype(jnp.float32)
        shortcut = (wsc, bsc)

    # conv1: fused BN1 + ReLU + stride-s 3x3 conv (+ fused 1x1 shortcut proj).
    outs = _conv3x3_call(x, scale1, bias1, w1, b1, stride=s, cpi=cpi, cpo=cpo,
                         compute_dtype=compute_dtype, out_dtype=compute_dtype,
                         shortcut=shortcut)
    if identity_sc:
        h1 = outs[0]
        resid = x.reshape(n, ho * wo, cpo)  # cpi == cpo; no projection matmul
    else:
        h1, resid = outs[0], outs[1]

    # conv2: fused BN2 + ReLU + 3x3 conv + bias + residual add.
    # TODO(synk): nn.Dropout() between relu(bn2) and conv2 is identity in eval
    # mode; train-mode dropout RNG is not implemented.
    h1_nhwc = h1.reshape(n, ho, wo, cpo)
    out_flat = _conv3x3_call(h1_nhwc, scale2, bias2, w2, b2, stride=1,
                             cpi=cpo, cpo=cpo, compute_dtype=compute_dtype,
                             out_dtype=out_dtype, resid=resid)[0]

    out = out_flat.reshape(n, ho, wo, cpo)[:, :, :, :cout]
    return jnp.transpose(out, (0, 3, 1, 2))  # NHWC -> NCHW (model boundary)


# --------------------------- parameter construction ---------------------------

def make_params(key, cin, cout, stride):
    ks = jax.random.split(key, 14)
    p = {}
    # BatchNorm2d(cin): weight, bias, running_mean, running_var
    p["bn1"] = (jax.random.uniform(ks[0], (cin,), minval=0.5, maxval=1.5),
                0.1 * jax.random.normal(ks[1], (cin,)),
                0.1 * jax.random.normal(ks[2], (cin,)),
                jax.random.uniform(ks[3], (cin,), minval=0.5, maxval=1.5))
    # Conv2d(cin, cout, 3, stride, padding=1)
    p["conv1_w"] = 0.1 * jax.random.normal(ks[4], (cout, cin, 3, 3))
    p["conv1_b"] = 0.1 * jax.random.normal(ks[5], (cout,))
    # BatchNorm2d(cout)
    p["bn2"] = (jax.random.uniform(ks[6], (cout,), minval=0.5, maxval=1.5),
                0.1 * jax.random.normal(ks[7], (cout,)),
                0.1 * jax.random.normal(ks[8], (cout,)),
                jax.random.uniform(ks[9], (cout,), minval=0.5, maxval=1.5))
    # Conv2d(cout, cout, 3, 1, padding=1)
    p["conv2_w"] = 0.1 * jax.random.normal(ks[10], (cout, cout, 3, 3))
    p["conv2_b"] = 0.1 * jax.random.normal(ks[11], (cout,))
    # shortcut: Conv2d(cin, cout, 1, stride) only if a projection is needed
    if cin != cout or stride != 1:
        p["shortcut_w"] = 0.1 * jax.random.normal(ks[12], (cin, cout))  # (Cin, Cout)
        p["shortcut_b"] = 0.1 * jax.random.normal(ks[13], (cout,))
    return jax.tree_util.tree_map(lambda a: a.astype(jnp.float32), p)


# --------------------------------- pure-JAX ref --------------------------------

def ref_forward(x, params, stride, cin, cout):
    def bn(h, gamma, beta, mean, var):
        g = gamma[None, :, None, None]
        b = beta[None, :, None, None]
        m = mean[None, :, None, None]
        v = var[None, :, None, None]
        return (h - m) / jnp.sqrt(v + EPS) * g + b

    dn = ("NCHW", "OIHW", "NCHW")
    h = jax.nn.relu(bn(x, *params["bn1"]))
    h = jax.lax.conv_general_dilated(h, params["conv1_w"], (stride, stride),
                                     ((1, 1), (1, 1)), dimension_numbers=dn)
    h = h + params["conv1_b"][None, :, None, None]
    h = jax.nn.relu(bn(h, *params["bn2"]))
    h = jax.lax.conv_general_dilated(h, params["conv2_w"], (1, 1),
                                     ((1, 1), (1, 1)), dimension_numbers=dn)
    h = h + params["conv2_b"][None, :, None, None]
    if cin != cout or stride != 1:
        w1x1 = jnp.transpose(params["shortcut_w"], (1, 0))[:, :, None, None]  # OIHW
        s = jax.lax.conv_general_dilated(x, w1x1, (stride, stride),
                                         ((0, 0), (0, 0)), dimension_numbers=dn)
        s = s + params["shortcut_b"][None, :, None, None]
    else:
        s = x
    return h + s


# ------------------------------------- main ------------------------------------

if __name__ == "__main__":
    key = jax.random.PRNGKey(0)
    kx, kp1, kp2 = jax.random.split(key, 3)

    # Case 1: projection shortcut (cin != cout, stride 2) — first block of a
    # layer.  f32 compute for a strict numerical check.
    N, CIN, H, W = 2, 4, 16, 16
    COUT, STRIDE = 8, 2
    x = jax.random.normal(kx, (N, CIN, H, W), dtype=jnp.float32)
    params = make_params(kp1, CIN, COUT, STRIDE)

    out = jax.block_until_ready(
        wide_basic_forward(x, params, STRIDE, compute_dtype=jnp.float32))
    ref = jax.block_until_ready(ref_forward(x, params, STRIDE, CIN, COUT))
    assert out.shape == (N, COUT, H // STRIDE, W // STRIDE), out.shape
    np.testing.assert_allclose(np.asarray(out), np.asarray(ref),
                               rtol=1e-4, atol=1e-4)

    # Case 2: identity shortcut (cin == cout, stride 1) — no 1x1 projection
    # matmul at all; the residual add is fused into conv2's epilogue.
    params2 = make_params(kp2, COUT, COUT, 1)
    x2 = out  # (2, 8, 8, 8)
    out2 = jax.block_until_ready(
        wide_basic_forward(x2, params2, 1, compute_dtype=jnp.float32))
    ref2 = jax.block_until_ready(ref_forward(x2, params2, 1, COUT, COUT))
    np.testing.assert_allclose(np.asarray(out2), np.asarray(ref2),
                               rtol=1e-4, atol=1e-4)

    # Default path: bf16 MXU operands (all generations incl. v5e), f32
    # accumulation + f32 BN/ReLU/bias epilogue, bf16 block output.
    out_bf16 = jax.block_until_ready(wide_basic_forward(x, params, STRIDE))
    np.testing.assert_allclose(
        np.asarray(out_bf16.astype(jnp.float32)), np.asarray(ref),
        rtol=5e-2, atol=5e-2)

    print("KERNEL_OK")
</pallas_src>

<mosaic_0001>
module attributes {stable_mosaic.version = 11 : i64} {
  func.func @k(%arg0: i32, %arg1: memref<8x128xf32, #tpu.memory_space<vmem>>, %arg2: memref<8x128xf32, #tpu.memory_space<vmem>>) attributes {dimension_semantics = [#tpu.dimension_semantics<arbitrary>], iteration_bounds = array<i64: 2>, scalar_prefetch = 0 : i64, scratch_operands = 0 : i64, tpu.core_type = #tpu.core_type<tc>, window_params = [{pipeline_mode = #tpu.pipeline_mode<synchronous>, transform_indices = @transform_0, window_bounds = array<i64: 8, 128>}, {pipeline_mode = #tpu.pipeline_mode<synchronous>, transform_indices = @transform_1, window_bounds = array<i64: 8, 128>}]} {
    %c0 = arith.constant 0 : index
    %c0_0 = arith.constant 0 : index
    %0 = vector.load %arg1[%c0, %c0_0] : memref<8x128xf32, #tpu.memory_space<vmem>>, vector<8x128xf32>
    %c0_1 = arith.constant 0 : index
    %c0_2 = arith.constant 0 : index
    %1 = vector.load %arg2[%c0_1, %c0_2] : memref<8x128xf32, #tpu.memory_space<vmem>>, vector<8x128xf32>
    tpu.vector_store %arg2[%c0_1, %c0_2], %0 {strides = array<i32>} : memref<8x128xf32, #tpu.memory_space<vmem>>, vector<8x128xf32>,
    return
  }
  func.func @transform_0(%arg0: i32) -> (i32, i32) {
    %c0_i32 = arith.constant 0 : i32
    %c0_i32_0 = arith.constant 0 : i32
    %c0_i32_1 = arith.constant 0 : i32
    return %c0_i32, %c0_i32_0 : i32, i32
  }
  func.func @transform_1(%arg0: i32) -> (i32, i32) {
    %c0_i32 = arith.constant 0 : i32
    %c0_i32_0 = arith.constant 0 : i32
    %c0_i32_1 = arith.constant 0 : i32
    return %c0_i32, %c0_i32_0 : i32, i32
  }
}

module attributes {stable_mosaic.version = 11 : i64} {
  func.func @kernel(%arg0: i32, %arg1: memref<2x8x2x8x256xf32, #tpu.memory_space<vmem>>, %arg2: memref<1x128xf32, #tpu.memory_space<vmem>>, %arg3: memref<1x128xf32, #tpu.memory_space<vmem>>, %arg4: memref<9x128x128xf32, #tpu.memory_space<vmem>>, %arg5: memref<1x128xf32, #tpu.memory_space<vmem>>, %arg6: memref<128x128xf32, #tpu.memory_space<vmem>>, %arg7: memref<1x128xf32, #tpu.memory_space<vmem>>, %arg8: memref<2x64x128xf32, #tpu.memory_space<vmem>>, %arg9: memref<2x64x128xf32, #tpu.memory_space<vmem>>) attributes {dimension_semantics = [#tpu.dimension_semantics<parallel>], iteration_bounds = array<i64: 1>, scalar_prefetch = 0 : i64, scratch_operands = 0 : i64, tpu.core_type = #tpu.core_type<tc>, window_params = [{transform_indices = @transform_0, window_bounds = array<i64: 2, 8, 2, 8, 256>}, {pipeline_mode = #tpu.pipeline_mode<synchronous>, transform_indices = @transform_1, window_bounds = array<i64: 1, 128>}, {pipeline_mode = #tpu.pipeline_mode<synchronous>, transform_indices = @transform_2, window_bounds = array<i64: 1, 128>}, {pipeline_mode = #tpu.pipeline_mode<synchronous>, transform_indices = @transform_3, window_bounds = array<i64: 9, 128, 128>}, {pipeline_mode = #tpu.pipeline_mode<synchronous>, transform_indices = @transform_4, window_bounds = array<i64: 1, 128>}, {pipeline_mode = #tpu.pipeline_mode<synchronous>, transform_indices = @transform_5, window_bounds = array<i64: 128, 128>}, {pipeline_mode = #tpu.pipeline_mode<synchronous>, transform_indices = @transform_6, window_bounds = array<i64: 1, 128>}, {transform_indices = @transform_7, window_bounds = array<i64: 2, 64, 128>}, {transform_indices = @transform_8, window_bounds = array<i64: 2, 64, 128>}]} {
    %c0 = arith.constant 0 : index
    %c0_0 = arith.constant 0 : index
    %0 = vector.load %arg2[%c0, %c0_0] : memref<1x128xf32, #tpu.memory_space<vmem>>, vector<1x128xf32>
    %1 = vector.shape_cast %0 : vector<1x128xf32> to vector<1x1x1x128xf32>
    %c0_1 = arith.constant 0 : index
    %c0_2 = arith.constant 0 : index
    %2 = vector.load %arg3[%c0_1, %c0_2] : memref<1x128xf32, #tpu.memory_space<vmem>>, vector<1x128xf32>
    %3 = vector.shape_cast %2 : vector<1x128xf32> to vector<1x1x1x128xf32>
    %c0_3 = arith.constant 0 : index
    %c0_4 = arith.constant 0 : index
    %c0_5 = arith.constant 0 : index
    %c0_6 = arith.constant 0 : index
    %c0_7 = arith.constant 0 : index
    %4 = vector.load %arg1[%c0_3, %c0_4, %c0_5, %c0_6, %c0_7] : memref<2x8x2x8x256xf32, #tpu.memory_space<vmem>>, vector<2x8x1x8x128xf32>
    %5 = vector.shape_cast %4 : vector<2x8x1x8x128xf32> to vector<2x8x8x128xf32>
    %6 = vector.broadcast %1 : vector<1x1x1x128xf32> to vector<2x8x8x128xf32>
    %7 = arith.mulf %5, %6 : vector<2x8x8x128xf32>
    %8 = vector.broadcast %3 : vector<1x1x1x128xf32> to vector<2x8x8x128xf32>
    %9 = arith.addf %7, %8 : vector<2x8x8x128xf32>
    %cst = arith.constant 0.000000e+00 : f32
    %10 = vector.broadcast %cst : f32 to vector<2x8x8x128xf32>
    %11 = arith.maximumf %9, %10 : vector<2x8x8x128xf32>
    %c0_8 = arith.constant 0 : index
    %c0_9 = arith.constant 0 : index
    %c0_10 = arith.constant 0 : index
    %c0_11 = arith.constant 0 : index
    %c128 = arith.constant 128 : index
    %12 = vector.load %arg1[%c0_8, %c0_9, %c0_10, %c0_11, %c128] : memref<2x8x2x8x256xf32, #tpu.memory_space<vmem>>, vector<2x8x1x8x128xf32>
    %13 = vector.shape_cast %12 : vector<2x8x1x8x128xf32> to vector<2x8x8x128xf32>
    %14 = vector.broadcast %1 : vector<1x1x1x128xf32> to vector<2x8x8x128xf32>
    %15 = arith.mulf %13, %14 : vector<2x8x8x128xf32>
    %16 = vector.broadcast %3 : vector<1x1x1x128xf32> to vector<2x8x8x128xf32>
    %17 = arith.addf %15, %16 : vector<2x8x8x128xf32>
    %cst_12 = arith.constant 0.000000e+00 : f32
    %18 = vector.broadcast %cst_12 : f32 to vector<2x8x8x128xf32>
    %19 = arith.maximumf %17, %18 : vector<2x8x8x128xf32>
    %c0_13 = arith.constant 0 : index
    %c0_14 = arith.constant 0 : index
    %c1 = arith.constant 1 : index
    %c0_15 = arith.constant 0 : index
    %c0_16 = arith.constant 0 : index
    %20 = vector.load %arg1[%c0_13, %c0_14, %c1, %c0_15, %c0_16] : memref<2x8x2x8x256xf32, #tpu.memory_space<vmem>>, vector<2x8x1x8x128xf32>
    %21 = vector.shape_cast %20 : vector<2x8x1x8x128xf32> to vector<2x8x8x128xf32>
    %22 = vector.broadcast %1 : vector<1x1x1x128xf32> to vector<2x8x8x128xf32>
    %23 = arith.mulf %21, %22 : vector<2x8x8x128xf32>
    %24 = vector.broadcast %3 : vector<1x1x1x128xf32> to vector<2x8x8x128xf32>
    %25 = arith.addf %23, %24 : vector<2x8x8x128xf32>
    %cst_17 = arith.constant 0.000000e+00 : f32
    %26 = vector.broadcast %cst_17 : f32 to vector<2x8x8x128xf32>
    %27 = arith.maximumf %25, %26 : vector<2x8x8x128xf32>
    %c0_18 = arith.constant 0 : index
    %c0_19 = arith.constant 0 : index
    %c1_20 = arith.constant 1 : index
    %c0_21 = arith.constant 0 : index
    %c128_22 = arith.constant 128 : index
    %28 = vector.load %arg1[%c0_18, %c0_19, %c1_20, %c0_21, %c128_22] : memref<2x8x2x8x256xf32, #tpu.memory_space<vmem>>, vector<2x8x1x8x128xf32>
    %29 = vector.shape_cast %28 : vector<2x8x1x8x128xf32> to vector<2x8x8x128xf32>
    %30 = vector.broadcast %1 : vector<1x1x1x128xf32> to vector<2x8x8x128xf32>
    %31 = arith.mulf %29, %30 : vector<2x8x8x128xf32>
    %32 = vector.broadcast %3 : vector<1x1x1x128xf32> to vector<2x8x8x128xf32>
    %33 = arith.addf %31, %32 : vector<2x8x8x128xf32>
    %cst_23 = arith.constant 0.000000e+00 : f32
    %34 = vector.broadcast %cst_23 : f32 to vector<2x8x8x128xf32>
    %35 = arith.maximumf %33, %34 : vector<2x8x8x128xf32>
    %cst_24 = arith.constant 0.000000e+00 : f32
    %36 = vector.broadcast %cst_24 : f32 to vector<2x1x8x128xf32>
    %cst_25 = arith.constant 0.000000e+00 : f32
    %37 = vector.broadcast %cst_25 : f32 to vector<2x8x1x128xf32>
    %38 = vector.extract_strided_slice %35 {offsets = [0, 0, 0, 0], sizes = [2, 7, 8, 128], strides = [1, 1, 1, 1]} : vector<2x8x8x128xf32> to vector<2x7x8x128xf32>
    %39 = tpu.concatenate %36, %38 in 1 : vector<2x1x8x128xf32>, vector<2x7x8x128xf32> -> vector<2x8x8x128xf32>
    %40 = vector.extract_strided_slice %39 {offsets = [0, 0, 0, 0], sizes = [2, 8, 7, 128], strides = [1, 1, 1, 1]} : vector<2x8x8x128xf32> to vector<2x8x7x128xf32>
    %41 = tpu.concatenate %37, %40 in 2 : vector<2x8x1x128xf32>, vector<2x8x7x128xf32> -> vector<2x8x8x128xf32>
    %42 = vector.shape_cast %41 : vector<2x8x8x128xf32> to vector<128x128xf32>
    %c0_26 = arith.constant 0 : index
    %c0_27 = arith.constant 0 : index
    %c0_28 = arith.constant 0 : index
    %43 = vector.load %arg4[%c0_26, %c0_27, %c0_28] : memref<9x128x128xf32, #tpu.memory_space<vmem>>, vector<1x128x128xf32>
    %44 = vector.shape_cast %43 : vector<1x128x128xf32> to vector<128x128xf32>
    %cst_29 = arith.constant dense<0.000000e+00> : vector<128x128xf32>
    %45 = tpu.matmul %42, %44, %cst_29 {dimension_numbers = #tpu.dot_dimension_numbers<[1], [0], [0], [1], [0, 0, 1, 1], [], []>} : vector<128x128xf32>, vector<128x128xf32>, vector<128x128xf32> -> vector<128x128xf32>
    %46 = vector.extract_strided_slice %27 {offsets = [0, 0, 0, 0], sizes = [2, 7, 8, 128], strides = [1, 1, 1, 1]} : vector<2x8x8x128xf32> to vector<2x7x8x128xf32>
    %47 = tpu.concatenate %36, %46 in 1 : vector<2x1x8x128xf32>, vector<2x7x8x128xf32> -> vector<2x8x8x128xf32>
    %48 = vector.shape_cast %47 : vector<2x8x8x128xf32> to vector<128x128xf32>
    %c1_30 = arith.constant 1 : index
    %c0_31 = arith.constant 0 : index
    %c0_32 = arith.constant 0 : index
    %49 = vector.load %arg4[%c1_30, %c0_31, %c0_32] : memref<9x128x128xf32, #tpu.memory_space<vmem>>, vector<1x128x128xf32>
    %50 = vector.shape_cast %49 : vector<1x128x128xf32> to vector<128x128xf32>
    %cst_33 = arith.constant dense<0.000000e+00> : vector<128x128xf32>
    %51 = tpu.matmul %48, %50, %cst_33 {dimension_numbers = #tpu.dot_dimension_numbers<[1], [0], [0], [1], [0, 0, 1, 1], [], []>} : vector<128x128xf32>, vector<128x128xf32>, vector<128x128xf32> -> vector<128x128xf32>
    %52 = arith.addf %45, %51 : vector<128x128xf32>
    %53 = vector.extract_strided_slice %35 {offsets = [0, 0, 0, 0], sizes = [2, 7, 8, 128], strides = [1, 1, 1, 1]} : vector<2x8x8x128xf32> to vector<2x7x8x128xf32>
    %54 = tpu.concatenate %36, %53 in 1 : vector<2x1x8x128xf32>, vector<2x7x8x128xf32> -> vector<2x8x8x128xf32>
    %55 = vector.shape_cast %54 : vector<2x8x8x128xf32> to vector<128x128xf32>
    %c2 = arith.constant 2 : index
    %c0_34 = arith.constant 0 : index
    %c0_35 = arith.constant 0 : index
    %56 = vector.load %arg4[%c2, %c0_34, %c0_35] : memref<9x128x128xf32, #tpu.memory_space<vmem>>, vector<1x128x128xf32>
    %57 = vector.shape_cast %56 : vector<1x128x128xf32> to vector<128x128xf32>
    %cst_36 = arith.constant dense<0.000000e+00> : vector<128x128xf32>
    %58 = tpu.matmul %55, %57, %cst_36 {dimension_numbers = #tpu.dot_dimension_numbers<[1], [0], [0], [1], [0, 0, 1, 1], [], []>} : vector<128x128xf32>, vector<128x128xf32>, vector<128x128xf32> -> vector<128x128xf32>
    %59 = arith.addf %52, %58 : vector<128x128xf32>
    %60 = vector.extract_strided_slice %19 {offsets = [0, 0, 0, 0], sizes = [2, 8, 7, 128], strides = [1, 1, 1, 1]} : vector<2x8x8x128xf32> to vector<2x8x7x128xf32>
    %61 = tpu.concatenate %37, %60 in 2 : vector<2x8x1x128xf32>, vector<2x8x7x128xf32> -> vector<2x8x8x128xf32>
    %62 = vector.shape_cast %61 : vector<2x8x8x128xf32> to vector<128x128xf32>
    %c3 = arith.constant 3 : index
    %c0_37 = arith.constant 0 : index
    %c0_38 = arith.constant 0 : index
    %63 = vector.load %arg4[%c3, %c0_37, %c0_38] : memref<9x128x128xf32, #tpu.memory_space<vmem>>, vector<1x128x128xf32>
    %64 = vector.shape_cast %63 : vector<1x128x128xf32> to vector<128x128xf32>
    %cst_39 = arith.constant dense<0.000000e+00> : vector<128x128xf32>
    %65 = tpu.matmul %62, %64, %cst_39 {dimension_numbers = #tpu.dot_dimension_numbers<[1], [0], [0], [1], [0, 0, 1, 1], [], []>} : vector<128x128xf32>, vector<128x128xf32>, vector<128x128xf32> -> vector<128x128xf32>
    %66 = arith.addf %59, %65 : vector<128x128xf32>
    %67 = vector.shape_cast %11 : vector<2x8x8x128xf32> to vector<128x128xf32>
    %c4 = arith.constant 4 : index
    %c0_40 = arith.constant 0 : index
    %c0_41 = arith.constant 0 : index
    %68 = vector.load %arg4[%c4, %c0_40, %c0_41] : memref<9x128x128xf32, #tpu.memory_space<vmem>>, vector<1x128x128xf32>
    %69 = vector.shape_cast %68 : vector<1x128x128xf32> to vector<128x128xf32>
    %cst_42 = arith.constant dense<0.000000e+00> : vector<128x128xf32>
    %70 = tpu.matmul %67, %69, %cst_42 {dimension_numbers = #tpu.dot_dimension_numbers<[1], [0], [0], [1], [0, 0, 1, 1], [], []>} : vector<128x128xf32>, vector<128x128xf32>, vector<128x128xf32> -> vector<128x128xf32>
    %71 = arith.addf %66, %70 : vector<128x128xf32>
    %72 = vector.shape_cast %19 : vector<2x8x8x128xf32> to vector<128x128xf32>
    %c5 = arith.constant 5 : index
    %c0_43 = arith.constant 0 : index
    %c0_44 = arith.constant 0 : index
    %73 = vector.load %arg4[%c5, %c0_43, %c0_44] : memref<9x128x128xf32, #tpu.memory_space<vmem>>, vector<1x128x128xf32>
    %74 = vector.shape_cast %73 : vector<1x128x128xf32> to vector<128x128xf32>
    %cst_45 = arith.constant dense<0.000000e+00> : vector<128x128xf32>
    %75 = tpu.matmul %72, %74, %cst_45 {dimension_numbers = #tpu.dot_dimension_numbers<[1], [0], [0], [1], [0, 0, 1, 1], [], []>} : vector<128x128xf32>, vector<128x128xf32>, vector<128x128xf32> -> vector<128x128xf32>
    %76 = arith.addf %71, %75 : vector<128x128xf32>
    %77 = vector.extract_strided_slice %35 {offsets = [0, 0, 0, 0], sizes = [2, 8, 7, 128], strides = [1, 1, 1, 1]} : vector<2x8x8x128xf32> to vector<2x8x7x128xf32>
    %78 = tpu.concatenate %37, %77 in 2 : vector<2x8x1x128xf32>, vector<2x8x7x128xf32> -> vector<2x8x8x128xf32>
    %79 = vector.shape_cast %78 : vector<2x8x8x128xf32> to vector<128x128xf32>
    %c6 = arith.constant 6 : index
    %c0_46 = arith.constant 0 : index
    %c0_47 = arith.constant 0 : index
    %80 = vector.load %arg4[%c6, %c0_46, %c0_47] : memref<9x128x128xf32, #tpu.memory_space<vmem>>, vector<1x128x128xf32>
    %81 = vector.shape_cast %80 : vector<1x128x128xf32> to vector<128x128xf32>
    %cst_48 = arith.constant dense<0.000000e+00> : vector<128x128xf32>
    %82 = tpu.matmul %79, %81, %cst_48 {dimension_numbers = #tpu.dot_dimension_numbers<[1], [0], [0], [1], [0, 0, 1, 1], [], []>} : vector<128x128xf32>, vector<128x128xf32>, vector<128x128xf32> -> vector<128x128xf32>
    %83 = arith.addf %76, %82 : vector<128x128xf32>
    %84 = vector.shape_cast %27 : vector<2x8x8x128xf32> to vector<128x128xf32>
    %c7 = arith.constant 7 : index
    %c0_49 = arith.constant 0 : index
    %c0_50 = arith.constant 0 : index
    %85 = vector.load %arg4[%c7, %c0_49, %c0_50] : memref<9x128x128xf32, #tpu.memory_space<vmem>>, vector<1x128x128xf32>
    %86 = vector.shape_cast %85 : vector<1x128x128xf32> to vector<128x128xf32>
    %cst_51 = arith.constant dense<0.000000e+00> : vector<128x128xf32>
    %87 = tpu.matmul %84, %86, %cst_51 {dimension_numbers = #tpu.dot_dimension_numbers<[1], [0], [0], [1], [0, 0, 1, 1], [], []>} : vector<128x128xf32>, vector<128x128xf32>, vector<128x128xf32> -> vector<128x128xf32>
    %88 = arith.addf %83, %87 : vector<128x128xf32>
    %89 = vector.shape_cast %35 : vector<2x8x8x128xf32> to vector<128x128xf32>
    %c8 = arith.constant 8 : index
    %c0_52 = arith.constant 0 : index
    %c0_53 = arith.constant 0 : index
    %90 = vector.load %arg4[%c8, %c0_52, %c0_53] : memref<9x128x128xf32, #tpu.memory_space<vmem>>, vector<1x128x128xf32>
    %91 = vector.shape_cast %90 : vector<1x128x128xf32> to vector<128x128xf32>
    %cst_54 = arith.constant dense<0.000000e+00> : vector<128x128xf32>
    %92 = tpu.matmul %89, %91, %cst_54 {dimension_numbers = #tpu.dot_dimension_numbers<[1], [0], [0], [1], [0, 0, 1, 1], [], []>} : vector<128x128xf32>, vector<128x128xf32>, vector<128x128xf32> -> vector<128x128xf32>
    %93 = arith.addf %88, %92 : vector<128x128xf32>
    %c0_55 = arith.constant 0 : index
    %c0_56 = arith.constant 0 : index
    %94 = vector.load %arg5[%c0_55, %c0_56] : memref<1x128xf32, #tpu.memory_space<vmem>>, vector<1x128xf32>
    %95 = vector.broadcast %94 : vector<1x128xf32> to vector<128x128xf32>
    %96 = arith.addf %93, %95 : vector<128x128xf32>
    %97 = vector.shape_cast %96 : vector<128x128xf32> to vector<2x64x128xf32>
    %c0_57 = arith.constant 0 : index
    %c0_58 = arith.constant 0 : index
    %c0_59 = arith.constant 0 : index
    %98 = vector.load %arg8[%c0_57, %c0_58, %c0_59] : memref<2x64x128xf32, #tpu.memory_space<vmem>>, vector<2x64x128xf32>
    tpu.vector_store %arg8[%c0_57, %c0_58, %c0_59], %97 {strides = array<i32>} : memref<2x64x128xf32, #tpu.memory_space<vmem>>, vector<2x64x128xf32>,
    %c0_60 = arith.constant 0 : index
    %c0_61 = arith.constant 0 : index
    %c0_62 = arith.constant 0 : index
    %c0_63 = arith.constant 0 : index
    %c0_64 = arith.constant 0 : index
    %99 = vector.load %arg1[%c0_60, %c0_61, %c0_62, %c0_63, %c0_64] : memref<2x8x2x8x256xf32, #tpu.memory_space<vmem>>, vector<2x8x1x8x128xf32>
    %100 = vector.shape_cast %99 : vector<2x8x1x8x128xf32> to vector<2x8x8x128xf32>
    %101 = vector.shape_cast %100 : vector<2x8x8x128xf32> to vector<128x128xf32>
    %c0_65 = arith.constant 0 : index
    %c0_66 = arith.constant 0 : index
    %102 = vector.load %arg6[%c0_65, %c0_66] : memref<128x128xf32, #tpu.memory_space<vmem>>, vector<128x128xf32>
    %cst_67 = arith.constant dense<0.000000e+00> : vector<128x128xf32>
    %103 = tpu.matmul %101, %102, %cst_67 {dimension_numbers = #tpu.dot_dimension_numbers<[1], [0], [0], [1], [0, 0, 1, 1], [], []>} : vector<128x128xf32>, vector<128x128xf32>, vector<128x128xf32> -> vector<128x128xf32>
    %c0_68 = arith.constant 0 : index
    %c0_69 = arith.constant 0 : index
    %104 = vector.load %arg7[%c0_68, %c0_69] : memref<1x128xf32, #tpu.memory_space<vmem>>, vector<1x128xf32>
    %105 = vector.broadcast %104 : vector<1x128xf32> to vector<128x128xf32>
    %106 = arith.addf %103, %105 : vector<128x128xf32>
    %107 = vector.shape_cast %106 : vector<128x128xf32> to vector<2x64x128xf32>
    %c0_70 = arith.constant 0 : index
    %c0_71 = arith.constant 0 : index
    %c0_72 = arith.constant 0 : index
    %108 = vector.load %arg9[%c0_70, %c0_71, %c0_72] : memref<2x64x128xf32, #tpu.memory_space<vmem>>, vector<2x64x128xf32>
    tpu.vector_store %arg9[%c0_70, %c0_71, %c0_72], %107 {strides = array<i32>} : memref<2x64x128xf32, #tpu.memory_space<vmem>>, vector<2x64x128xf32>,
    return
  }
  func.func @transform_0(%arg0: i32) -> (i32, i32, i32, i32, i32) {
    %c0_i32 = arith.constant 0 : i32
    %c0_i32_0 = arith.constant 0 : i32
    %c0_i32_1 = arith.constant 0 : i32
    %c0_i32_2 = arith.constant 0 : i32
    %c0_i32_3 = arith.constant 0 : i32
    return %arg0, %c0_i32, %c0_i32_0, %c0_i32_1, %c0_i32_2 : i32, i32, i32, i32, i32
  }
  func.func @transform_1(%arg0: i32) -> (i32, i32) {
    %c0_i32 = arith.constant 0 : i32
    %c0_i32_0 = arith.constant 0 : i32
    %c0_i32_1 = arith.constant 0 : i32
    return %c0_i32, %c0_i32_0 : i32, i32
  }
  func.func @transform_2(%arg0: i32) -> (i32, i32) {
    %c0_i32 = arith.constant 0 : i32
    %c0_i32_0 = arith.constant 0 : i32
    %c0_i32_1 = arith.constant 0 : i32
    return %c0_i32, %c0_i32_0 : i32, i32
  }
  func.func @transform_3(%arg0: i32) -> (i32, i32, i32) {
    %c0_i32 = arith.constant 0 : i32
    %c0_i32_0 = arith.constant 0 : i32
    %c0_i32_1 = arith.constant 0 : i32
    %c0_i32_2 = arith.constant 0 : i32
    return %c0_i32, %c0_i32_0, %c0_i32_1 : i32, i32, i32
  }
  func.func @transform_4(%arg0: i32) -> (i32, i32) {
    %c0_i32 = arith.constant 0 : i32
    %c0_i32_0 = arith.constant 0 : i32
    %c0_i32_1 = arith.constant 0 : i32
    return %c0_i32, %c0_i32_0 : i32, i32
  }
  func.func @transform_5(%arg0: i32) -> (i32, i32) {
    %c0_i32 = arith.constant 0 : i32
    %c0_i32_0 = arith.constant 0 : i32
    %c0_i32_1 = arith.constant 0 : i32
    return %c0_i32, %c0_i32_0 : i32, i32
  }
  func.func @transform_6(%arg0: i32) -> (i32, i32) {
    %c0_i32 = arith.constant 0 : i32
    %c0_i32_0 = arith.constant 0 : i32
    %c0_i32_1 = arith.constant 0 : i32
    return %c0_i32, %c0_i32_0 : i32, i32
  }
  func.func @transform_7(%arg0: i32) -> (i32, i32, i32) {
    %c0_i32 = arith.constant 0 : i32
    %c0_i32_0 = arith.constant 0 : i32
    %c0_i32_1 = arith.constant 0 : i32
    return %arg0, %c0_i32, %c0_i32_0 : i32, i32, i32
  }
  func.func @transform_8(%arg0: i32) -> (i32, i32, i32) {
    %c0_i32 = arith.constant 0 : i32
    %c0_i32_0 = arith.constant 0 : i32
    %c0_i32_1 = arith.constant 0 : i32
    return %arg0, %c0_i32, %c0_i32_0 : i32, i32, i32
  }
}

</mosaic_0001>

<bundles_post_ra>
// kernel: tpu_custom_call.1
= control target key start
LH: loop header
LB: loop body
LE: loop exit
PB: predicated region body
PF: predicated region fallthrough
CT: control target
= control target key end

     0   :  { %6 = vsyncpa [#allocation3], 0  ;;  %s340_s0 = inlined_call_operand.hbm [shape: f32[8,128], index: 0, kind: input, shape index: {}]   ;;  %s341_s1 = inlined_call_operand.hbm [shape: f32[8,128], index: 1, kind: output, shape index: {}]  }
   0x1   :  { %7 = vsyncpa [#allocation4], 0  ;;  %s261_s6 = smov 0  }
   0x2 LB: > { %s144_s7 = sadd.s32 4294967295, %s247_s6   ;;  %p145_p0 = scmp.ge.s32.totalorder %s247_s6, 1  ;;  %s247_s6 = sphi %s261_s6, %s13_s6  }
   0x3   : > { %p60_p1 = scmp.lt.s32.totalorder %s247_s6, 3  ;;  %p275_p3 = scmp.eq.s32.totalorder %s144_s7, 0 }
   0x4   : > { %s249_s10 = smov [#allocation2]   ;;  %s179_s15 = scalar_lea.hbm %s340_s0, 128 }
   0x5   : > { %p269_p2 = pnand %p145_p0, %p60_p1  ;;  %s73_s11 = sshll.u32 %s249_s10, 4  ;;  %s74_s11 = int_to_ptr.vmem [resolvable:$true] %s73_s11 }
   0x6   : > { %s346_s9 = scalar_select %p275_p3, 1, 0 }
   0x7   : > { %s345_s8 = scalar_select %p269_p2, 1, 0 }
   0x8   : > { %p161_p4 = pneg %p269_p2  ;;  %p180_p6 = scmp.ne.s32.totalorder %s340_s0, %s179_s15 }
   0x9   : > { %p186_p10 = scmp.lt.u32.totalorder %s179_s15, %s340_s0 }
   0xa   : > { %p283_p5 = pnand %p275_p3, %p161_p4 }
   0xc   : > { %p181_p7 = pneg %p283_p5 }
   0xe   : > { %p182_p8 = pnand %p181_p7, %p180_p6 }
  0x10   : > { %p183_p9 = pneg %p182_p8 }
  0x12   : > { %p188_p11 = pnand %p186_p10, %p183_p9 }
  0x14   : > { %191 = shalt.err (!%p188_p11)
}
  0x15   : > { %s192_s20 = scalar_lea.vmem %s74_s11, 128  ;;  %p200_p1 = scmp.lt.s32.totalorder %s74_s11, %s74_s11 }
  0x16   : > { %p193_p12 = scmp.ne.s32.totalorder %s74_s11, %s192_s20  ;;  %p201_p4 = scmp.lt.s32.totalorder %s192_s20, %s192_s20 }
  0x18   : > { %p195_p13 = pnand %p193_p12, %p181_p7  ;;  %p202_p3 = por %p201_p4, %p200_p1 }
  0x1a   : > { %p196_p0 = pneg %p195_p13 }
  0x1c   : > { %p203_p2 = pnand %p202_p3, %p196_p0 }
  0x1e   : > { %206 = shalt.err (!%p203_p2)
}
  0x1f   : > { %164 = dma.hbm_to_vmem [thread:$0]  (!%p283_p5), %s340_s0, 128, %s74_s11, [#allocation3]  }
  0x20   : > { %p348_p6 = scmp.ne.s32.totalorder %s345_s8, 0 }
  0x21   : > { %p349_p8 = scmp.ne.s32.totalorder (!%p348_p6), %s346_s9, 0 }
  0x22   : > { %86 = sbr.rel (%p348_p6) target bundleno = 67 (0x43), region = 24 }
  0x29   : > { %238 = dma.done.wait (%p349_p8), [#allocation3], 128  }
  0x2a   : > { %240 = vsyncadd (%p349_p8), [#allocation3], 4294967168  ;;  %s250_s23 = smov [#allocation5]   ;;  %p311_p2 = scmp.eq.s32.totalorder %s144_s7, 1  ;;  %v96_v0 = vld [vmem:[#allocation2] sm:$0xff] }
  0x2b   : > { %s105_s24 = sshll.u32 %s250_s23, 4  ;;  %97 = vst [vmem:[#allocation5] sm:$0xff] %v96_v0  ;;  %s106_s24 = int_to_ptr.vmem [resolvable:$true] %s105_s24 }
  0x2c   : > { %s207_s26 = scalar_lea.vmem %s106_s24, 128  ;;  %p214_p9 = scmp.lt.s32.totalorder %s106_s24, %s106_s24 }
  0x2d   : > { %p208_p3 = scmp.ne.s32.totalorder %s106_s24, %s207_s26  ;;  %p215_p10 = scmp.lt.s32.totalorder %s207_s26, %s207_s26 }
  0x2f   : > { %p209_p5 = pnand %p208_p3, %p311_p2  ;;  %p216_p11 = por %p215_p10, %p214_p9 }
  0x31   : > { %p210_p7 = pneg %p209_p5 }
  0x33   : > { %p217_p12 = pnand %p216_p11, %p210_p7 }
  0x35   : > { %220 = shalt.err (!%p217_p12)
}
  0x36   : > { %s221_s29 = scalar_lea.hbm %s341_s1, 128 }
  0x37   : > { %p222_p13 = scmp.ne.s32.totalorder %s341_s1, %s221_s29  ;;  %p227_p4 = scmp.lt.u32.totalorder %s221_s29, %s341_s1 }
  0x39   : > { %p223_p0 = pnand %p222_p13, %p311_p2 }
  0x3b   : > { %p224_p1 = pneg %p223_p0 }
  0x3d   : > { %p229_p6 = pnand %p227_p4, %p224_p1 }
  0x3f   : > { %232 = shalt.err (!%p229_p6)
}
  0x40   : > { %158 = dma.vmem_to_hbm [thread:$0]  (%p311_p2), %s106_s24, 128, %s341_s1, [#allocation4]  }
  0x41   : > { %242 = dma.done.wait (%p311_p2), [#allocation4], 128  }
  0x42   : > { %244 = vsyncadd (%p311_p2), [#allocation4], 4294967168 }
  0x43 PF: > { %s13_s6 = sadd.s32 1, %s247_s6  }
  0x44   : > { %p10_p8 = scmp.ge.s32.totalorder %s13_s6, 4  }
  0x46   :  { %12 = sbr.rel (!%p10_p8) target bundleno = 2 (0x2), region = 53 }
  0x4d   :  { %118 = vsyncpa [#allocation3], 1 }
  0x4e   :  { %120 = vsyncpa [#allocation3 + $0x1], 1 }
  0x4f   :  { %121 = vsyncpa [#allocation4], 1 }
  0x50   :  { %123 = vsyncpa [#allocation4 + $0x1], 1 }

// kernel: tpu_custom_call.1
= control target key start
LH: loop header
LB: loop body
LE: loop exit
PB: predicated region body
PF: predicated region fallthrough
CT: control target
= control target key end

     0   :  { %14 = vsyncpa [#allocation3], 0  ;;  %s4683_s0 = inlined_call_operand.hbm [shape: f32[2,8,2,8,256], index: 0, kind: input, shape index: {}]   ;;  %s4684_s1 = inlined_call_operand.vmem [shape: f32[1,128], index: 1, kind: input, shape index: {}]   ;;  %s4685_s2 = inlined_call_operand.vmem [shape: f32[1,128], index: 2, kind: input, shape index: {}]   ;;  %s4686_s3 = inlined_call_operand.hbm [shape: f32[9,128,128], index: 3, kind: input, shape index: {}]   ;;  %s4687_s4 = inlined_call_operand.vmem [shape: f32[1,128], index: 4, kind: input, shape index: {}]   ;;  %s4688_s5 = inlined_call_operand.hbm [shape: f32[128,128], index: 5, kind: input, shape index: {}]   ;;  %s4689_s6 = inlined_call_operand.vmem [shape: f32[1,128], index: 6, kind: input, shape index: {}]   ;;  %s4690_s7 = inlined_call_operand.hbm [shape: f32[2,64,128], index: 7, kind: output, shape index: {0}]   ;;  %s4691_s8 = inlined_call_operand.hbm [shape: f32[2,64,128], index: 8, kind: output, shape index: {1}]  }
   0x1   :  { %15 = vsyncpa [#allocation6], 0 }
   0x2   :  { %16 = vsyncpa [#allocation4], 0 }
   0x3   :  { %17 = vsyncpa [#allocation10], 0  ;;  %s3875_s27 = smov [#allocation5]   ;;  %s3757_s9 = scalar_lea.hbm %s4686_s3, 18432 }
   0x4   :  { %s39_s28 = sshll.u32 %s3875_s27, 4  ;;  %p3758_p0 = scmp.ne.s32.totalorder %s4686_s3, %s3757_s9  ;;  %s40_s28 = int_to_ptr.vmem [resolvable:$true] %s39_s28 }
   0x5   :  { %p3761_p1 = scmp.lt.u32.totalorder %s3757_s9, %s4686_s3 }
   0x7   :  { %p3763_p2 = pnand %p3761_p1, %p3758_p0 }
   0x9   :  { %3766 = shalt.err (!%p3763_p2)
}
   0xa   :  { %s3767_s14 = scalar_lea.vmem %s40_s28, 18432  ;;  %p3772_p4 = scmp.lt.s32.totalorder %s40_s28, %s40_s28 }
   0xb   :  { %p3768_p3 = scmp.ne.s32.totalorder %s40_s28, %s3767_s14  ;;  %p3773_p5 = scmp.lt.s32.totalorder %s3767_s14, %s3767_s14 }
   0xd   :  { %p3774_p6 = por %p3773_p5, %p3772_p4 }
   0xf   :  { %p3775_p7 = pnand %p3774_p6, %p3768_p3 }
  0x11   :  { %3778 = shalt.err (!%p3775_p7)
}
  0x12   :  { %s3876_s15 = smov 128   ;;  %s3877_s16 = smov 8  }
  0x13   :  { %45 = dma.hbm_to_vmem [thread:$0]  %s4686_s3, 18432, %s40_s28, [#allocation6], %s3876_s15, %s3876_s15, %s3877_s16  }
  0x14   :  { %s3878_s19 = smov [#allocation2]   ;;  %s3779_s23 = scalar_lea.hbm %s4683_s0, 8192 }
  0x15   :  { %s23_s20 = sshll.u32 %s3878_s19, 4  ;;  %p3780_p8 = scmp.ne.s32.totalorder %s4683_s0, %s3779_s23  ;;  %s24_s20 = int_to_ptr.vmem [resolvable:$true] %s23_s20 }
  0x16   :  { %p3783_p9 = scmp.lt.u32.totalorder %s3779_s23, %s4683_s0 }
  0x18   :  { %p3785_p10 = pnand %p3783_p9, %p3780_p8 }
  0x1a   :  { %3788 = shalt.err (!%p3785_p10)
}
  0x1b   :  { %s3789_s29 = scalar_lea.vmem %s24_s20, 8192  ;;  %p3794_p12 = scmp.lt.s32.totalorder %s24_s20, %s24_s20 }
  0x1c   :  { %p3790_p11 = scmp.ne.s32.totalorder %s24_s20, %s3789_s29  ;;  %p3795_p13 = scmp.lt.s32.totalorder %s3789_s29, %s3789_s29 }
  0x1e   :  { %p3796_p0 = por %p3795_p13, %p3794_p12 }
  0x20   :  { %p3797_p1 = pnand %p3796_p0, %p3790_p11 }
  0x22   :  { %3800 = shalt.err (!%p3797_p1)
}
  0x23   :  { %s3879_s3 = smov 256   ;;  %s3880_s28 = smov 16  }
  0x24   :  { %29 = dma.hbm_to_vmem [thread:$0]  %s4683_s0, 8192, %s24_s20, [#allocation3], %s3879_s3, %s3879_s3, %s3880_s28  }
  0x25   :  { %s3881_s10 = smov [#allocation7]   ;;  %s3801_s14 = scalar_lea.hbm %s4688_s5, 2048 }
  0x26   :  { %s53_s11 = sshll.u32 %s3881_s10, 4  ;;  %p3802_p2 = scmp.ne.s32.totalorder %s4688_s5, %s3801_s14  ;;  %s54_s11 = int_to_ptr.vmem [resolvable:$true] %s53_s11 }
  0x27   :  { %p3805_p3 = scmp.lt.u32.totalorder %s3801_s14, %s4688_s5 }
  0x29   :  { %p3807_p4 = pnand %p3805_p3, %p3802_p2 }
  0x2b   :  { %3810 = shalt.err (!%p3807_p4)
}
  0x2c   :  { %s3811_s22 = scalar_lea.vmem %s54_s11, 2048  ;;  %p3816_p6 = scmp.lt.s32.totalorder %s54_s11, %s54_s11 }
  0x2d   :  { %p3812_p5 = scmp.ne.s32.totalorder %s54_s11, %s3811_s22  ;;  %p3817_p7 = scmp.lt.s32.totalorder %s3811_s22, %s3811_s22 }
  0x2f   :  { %p3818_p8 = por %p3817_p7, %p3816_p6 }
  0x31   :  { %p3819_p9 = pnand %p3818_p8, %p3812_p5 }
  0x33   :  { %3822 = shalt.err (!%p3819_p9)
}
  0x34   :  { %59 = dma.hbm_to_vmem [thread:$0]  %s4688_s5, 2048, %s54_s11, [#allocation6], %s3876_s15, %s3876_s15, %s3877_s16  }
  0x35   :  { %3867 = dma.done.wait [#allocation3], 8192  }
  0x36   :  { %3868 = vsyncadd [#allocation3], 4294959104 }
  0x37   :  { %3869 = dma.done.wait [#allocation6], 20480  }
  0x38   :  { %3870 = vsyncadd [#allocation6], 4294946816  ;;  %v4721_v0 = vmov 0.0   ;;  %v420_v1 = vld [vmem:[#allocation5 + $0x80] sm:$0xff]  ;;  %v421_v2 = vld [vmem:[#allocation5 + $0x88] sm:$0xff]  ;;  %vm387_vm0 = vcmask 1040384  }
  0x39   :  { %2769 = vmatprep.mubr.f32.mxu1 %v4721_v0  ;;  %v1147_v3 = vld [vmem:[#allocation5 + $0x200] sm:$0xff]  ;;  %v3297_v4 = vpack.c.bf16 %v421_v2, %v420_v1  ;;  %v1148_v5 = vld [vmem:[#allocation5 + $0x208] sm:$0xff]  ;;  %v422_v6 = vld [vmem:[#allocation5 + $0x90] sm:$0xff]  ;;  %s3884_s9 = smov [#allocation8]  }
  0x3a   :  { %v423_v7 = vld [vmem:[#allocation5 + $0x98] sm:$0xff]  ;;  %v3425_v8 = vpack.c.bf16 %v1148_v5, %v1147_v3  ;;  %v1149_v10 = vld [vmem:[#allocation5 + $0x210] sm:$0xff]  ;;  %v424_v12 = vld [vmem:[#allocation5 + $0xa0] sm:$0xff]  ;;  %s2288_s10 = sshll.u32 %s3884_s9, 4  ;;  %s4646_s10 = int_to_ptr.vmem [resolvable:$true] %s2288_s10 }
  0x3b   :  { %v3301_v9 = vpack.c.bf16 %v423_v7, %v422_v6  ;;  %v1150_v11 = vld [vmem:[#allocation5 + $0x218] sm:$0xff]  ;;  %3298 = vmatprep.subr.bf16.mxu1 %v3297_v4  ;;  %v425_v14 = vld [vmem:[#allocation5 + $0xa8] sm:$0xff]  ;;  %v1151_v15 = vld [vmem:[#allocation5 + $0x220] sm:$0xff] }
  0x3c   :  { %v3429_v13 = vpack.c.bf16 %v1150_v11, %v1149_v10  ;;  %v1152_v16 = vld [vmem:[#allocation5 + $0x228] sm:$0xff]  ;;  %3426 = vmatprep.subr.bf16.mxu0 %v3425_v8  ;;  %3300 = vmatpush3.bf16.msra.mxu1 %v3297_v4  ;;  %v3305_v17 = vpack.c.bf16 %v425_v14, %v424_v12  ;;  %v426_v19 = vld [vmem:[#allocation5 + $0xb0] sm:$0xff]  ;;  %v427_v20 = vld [vmem:[#allocation5 + $0xb8] sm:$0xff] }
  0x3d   :  { %3428 = vmatpush3.bf16.msra.mxu0 %v3425_v8  ;;  %3302 = vmatprep.subr.bf16.mxu1 %v3301_v9  ;;  %v3433_v18 = vpack.c.bf16 %v1152_v16, %v1151_v15  ;;  %v1153_v21 = vld [vmem:[#allocation5 + $0x230] sm:$0xff]  ;;  %v1154_v22 = vld [vmem:[#allocation5 + $0x238] sm:$0xff]  ;;  %v3309_v23 = vpack.c.bf16 %v427_v20, %v426_v19  ;;  %v428_v24 = vld [vmem:[#allocation5 + $0xc0] sm:$0xff] }
  0x3e   :  { %3430 = vmatprep.subr.bf16.mxu0 %v3429_v13  ;;  %v3437_v25 = vpack.c.bf16 %v1154_v22, %v1153_v21  ;;  %v429_v26 = vld [vmem:[#allocation5 + $0xc8] sm:$0xff]  ;;  %v1155_v27 = vld [vmem:[#allocation5 + $0x240] sm:$0xff]  ;;  %v430_v35 = vld [vmem:[#allocation5 + $0xd0] sm:$0xff] }
  0x3f   :  { %v3976_v28 = vld [vmem:[%s4684_s1] ss:$0 sm:$0xff]  ;;  %v1156_v29 = vld [vmem:[#allocation5 + $0x248] sm:$0xff]  ;;  %v3313_v33 = vpack.c.bf16 %v429_v26, %v428_v24  ;;  %v431_v36 = vld [vmem:[#allocation5 + $0xd8] sm:$0xff] }
  0x40   :  { %3304 = vmatpush3.bf16.msra.mxu1 %v3301_v9  ;;  %v3981_v30 = vld [vmem:[%s4685_s2] ss:$0 sm:$0xff]  ;;  %v3441_v34 = vpack.c.bf16 %v1156_v29, %v1155_v27  ;;  %v1157_v38 = vld [vmem:[#allocation5 + $0x250] sm:$0xff]  ;;  %v1158_v39 = vld [vmem:[#allocation5 + $0x258] sm:$0xff]  ;;  %v3317_v41 = vpack.c.bf16 %v431_v36, %v430_v35 }
  0x41   :  { %3432 = vmatpush3.bf16.msra.mxu0 %v3429_v13  ;;  %3306 = vmatprep.subr.bf16.mxu1 %v3305_v17  ;;  %v73_v31 = vld [vmem:[#allocation2] sm:$0xff]  ;;  %v3445_v42 = vpack.c.bf16 %v1158_v39, %v1157_v38  ;;  %v433_v44 = vld [vmem:[#allocation5 + $0xe8] sm:$0xff]  ;;  %v214_v47 = vld [vmem:[#allocation2 + $0x10] sm:$0xff] }
  0x42   :  { %3434 = vmatprep.subr.bf16.mxu0 %v3433_v18  ;;  %v95_v32 = vmul.f32 %v3976_v28, %v73_v31  ;;  %v432_v43 = vld [vmem:[#allocation5 + $0xe0] sm:$0xff]  ;;  %v1160_v46 = vld [vmem:[#allocation5 + $0x268] sm:$0xff]  ;;  %v434_v51 = vld [vmem:[#allocation5 + $0xf0] sm:$0xff]  ;;  %v230_v56 = vmul.f32 %v3976_v28, %v214_v47 }
  0x43   :  { %v1159_v45 = vld [vmem:[#allocation5 + $0x260] sm:$0xff]  ;;  %v3321_v48 = vpack.c.bf16 %v433_v44, %v432_v43  ;;  %v435_v52 = vld [vmem:[#allocation5 + $0xf8] sm:$0xff]  ;;  %v215_v53 = vld [vmem:[#allocation2 + $0x30] sm:$0xff] }
  0x44   :  { %3308 = vmatpush3.bf16.msra.mxu1 %v3305_v17  ;;  %v117_v37 = vadd.f32 %v3981_v30, %v95_v32  ;;  %v74_v49 = vld [vmem:[#allocation2 + $0x20] sm:$0xff]  ;;  %v3449_v50 = vpack.c.bf16 %v1160_v46, %v1159_v45  ;;  %v1161_v54 = vld [vmem:[#allocation5 + $0x270] sm:$0xff]  ;;  %v1162_v55 = vld [vmem:[#allocation5 + $0x278] sm:$0xff]  ;;  %v3325_v60 = vpack.c.bf16 %v435_v52, %v434_v51  ;;  %v231_v61 = vmul.f32 %v3976_v28, %v215_v53 }
  0x45   :  { %3436 = vmatpush3.bf16.msra.mxu0 %v3433_v18  ;;  %3310 = vmatprep.subr.bf16.mxu1 %v3309_v23  ;;  %v75_v57 = vld [vmem:[#allocation2 + $0x40] sm:$0xff]  ;;  %v96_v58 = vmul.f32 %v3976_v28, %v74_v49  ;;  %v216_v59 = vld [vmem:[#allocation2 + $0x50] sm:$0xff]  ;;  %v3453_v63 = vpack.c.bf16 %v1162_v55, %v1161_v54  ;;  %v404_v2 = vld [vmem:[#allocation5 + $0x8] sm:$0xff]  ;;  %v3990_v5 = vadd.f32 %v3981_v30, %v230_v56 }
  0x46   :  { %3438 = vmatprep.subr.bf16.mxu0 %v3437_v25  ;;  %v133_v40 = vmax.f32 %v117_v37, 0.0  ;;  %v76_v62 = vld [vmem:[#allocation2 + $0x60] sm:$0xff]  ;;  %v97_v3 = vmul.f32 %v3976_v28, %v75_v57  ;;  %v217_v4 = vld [vmem:[#allocation2 + $0x70] sm:$0xff]  ;;  %v1326_v7 = vld [vmem:[#allocation5 + $0x288] sm:$0xff]  ;;  %v232_v8 = vmul.f32 %v3976_v28, %v216_v59  ;;  %v3996_v14 = vadd.f32 %v3981_v30, %v231_v61 }
  0x47   :  { %v403_v1 = vld [vmem:[#allocation5] sm:$0xff]  ;;  %v118_v10 = vadd.f32 %v3981_v30, %v96_v58  ;;  %v98_v11 = vmul.f32 %v3976_v28, %v76_v62  ;;  %v218_v12 = vld [vmem:[#allocation2 + $0x90] sm:$0xff]  ;;  %v233_v15 = vmul.f32 %v3976_v28, %v217_v4  ;;  %v4705_v21 = vmax.f32 %v3990_v5, 0.0  ;;  %v406_v24 = vld [vmem:[#allocation5 + $0x18] sm:$0xff] }
  0x48   :  { %3312 = vmatpush3.bf16.msra.mxu1 %v3309_v23  ;;  %2993 = vmatprep.mubr.f32.mxu0 %v133_v40  ;;  %v1325_v6 = vld [vmem:[#allocation5 + $0x280] sm:$0xff]  ;;  %v3329_v13 = vpack.c.bf16 %v404_v2, %v403_v1  ;;  %v119_v18 = vadd.f32 %v3981_v30, %v97_v3  ;;  %v219_v20 = vld [vmem:[#allocation2 + $0xb0] sm:$0xff]  ;;  %v4003_v22 = vadd.f32 %v3981_v30, %v232_v8  ;;  %v1328_v32 = vld [vmem:[#allocation5 + $0x298] sm:$0xff]  ;;  %v4704_v35 = vmax.f32 %v3996_v14, 0.0 }
  0x49   :  { %3440 = vmatpush3.bf16.msra.mxu0 %v3437_v25  ;;  %3314 = vmatprep.subr.bf16.mxu1 %v3313_v33  ;;  %v77_v9 = vld [vmem:[#allocation2 + $0x80] sm:$0xff]  ;;  %v3457_v17 = vpack.c.bf16 %v1326_v7, %v1325_v6  ;;  %v405_v23 = vld [vmem:[#allocation5 + $0x10] sm:$0xff]  ;;  %v234_v25 = vmul.f32 %v3976_v28, %v218_v12  ;;  %v134_v27 = vmax.f32 %v118_v10, 0.0  ;;  %v120_v29 = vadd.f32 %v3981_v30, %v98_v11  ;;  %v408_v47 = vld [vmem:[#allocation5 + $0x28] sm:$0xff] }
  0x4a   :  { %3442 = vmatprep.subr.bf16.mxu0 %v3441_v34  ;;  %v78_v16 = vld [vmem:[#allocation2 + $0xa0] sm:$0xff]  ;;  %v99_v19 = vmul.f32 %v3976_v28, %v77_v9  ;;  %v1327_v31 = vld [vmem:[#allocation5 + $0x290] sm:$0xff]  ;;  %v4010_v36 = vadd.f32 %v3981_v30, %v233_v15  ;;  %v235_v37 = vmul.f32 %v3976_v28, %v219_v20  ;;  %v135_v39 = vmax.f32 %v119_v18, 0.0  ;;  %v1330_v53 = vld [vmem:[#allocation5 + $0x2a8] sm:$0xff] }
  0x4b   :  { %v79_v26 = vld [vmem:[#allocation2 + $0xc0] sm:$0xff]  ;;  %v3333_v40 = vpack.c.bf16 %v406_v24, %v405_v23  ;;  %v4703_v43 = vmax.f32 %v4003_v22, 0.0  ;;  %v3461_v44 = vpack.c.bf16 %v1328_v32, %v1327_v31  ;;  %v4019_v45 = vadd.f32 %v3981_v30, %v234_v25  ;;  %v222_v55 = vld [vmem:[#allocation2 + $0x110] sm:$0xff]  ;;  %v410_v6 = vld [vmem:[#allocation5 + $0x38] sm:$0xff] }
  0x4c   :  { %3316 = vmatpush3.bf16.msra.mxu1 %v3313_v33  ;;  %v100_v33 = vmul.f32 %v3976_v28, %v78_v16  ;;  %v80_v38 = vld [vmem:[#allocation2 + $0xe0] sm:$0xff]  ;;  %v4702_v56 = vmax.f32 %v4010_v36, 0.0  ;;  %v4028_v57 = vadd.f32 %v3981_v30, %v235_v37  ;;  %v409_v4 = vld [vmem:[#allocation5 + $0x30] sm:$0xff]  ;;  %v238_v7 = vmul.f32 %v3976_v28, %v222_v55  ;;  %v1332_v12 = vld [vmem:[#allocation5 + $0x2b8] sm:$0xff] }
  0x4d   :  { %3444 = vmatpush3.bf16.msra.mxu0 %v3441_v34  ;;  %3318 = vmatprep.subr.bf16.mxu1 %v3317_v41  ;;  %v220_v34 = vld [vmem:[#allocation2 + $0xd0] sm:$0xff]  ;;  %v407_v46 = vld [vmem:[#allocation5 + $0x20] sm:$0xff]  ;;  %v102_v54 = vmul.f32 %v3976_v28, %v80_v38  ;;  %v4701_v1 = vmax.f32 %v4019_v45, 0.0  ;;  %v3341_v20 = vpack.c.bf16 %v410_v6, %v409_v4  ;;  %v412_v32 = vld [vmem:[#allocation5 + $0x48] sm:$0xff] }
  0x4e   :  { %3446 = vmatprep.subr.bf16.mxu0 %v3445_v42  ;;  %v81_v49 = vld [vmem:[#allocation2 + $0x100] sm:$0xff]  ;;  %v122_v51 = vadd.f32 %v3981_v30, %v100_v33  ;;  %v1331_v11 = vld [vmem:[#allocation5 + $0x2b0] sm:$0xff]  ;;  %v4700_v16 = vmax.f32 %v4028_v57, 0.0  ;;  %vm4140_vm1 = vmneg %vm387_vm0 }
  0x4f   :  { %v1329_v52 = vld [vmem:[#allocation5 + $0x2a0] sm:$0xff]  ;;  %v103_v62 = vmul.f32 %v3976_v28, %v81_v49  ;;  %v124_v10 = vadd.f32 %v3981_v30, %v102_v54  ;;  %v224_v15 = vld [vmem:[#allocation2 + $0x150] sm:$0xff] }
  0x50   :  { %3320 = vmatpush3.bf16.msra.mxu1 %v3317_v41  ;;  %v121_v41 = vadd.f32 %v3981_v30, %v99_v19  ;;  %v82_v58 = vld [vmem:[#allocation2 + $0x120] sm:$0xff]  ;;  %v3465_v2 = vpack.c.bf16 %v1330_v53, %v1329_v52  ;;  %v138_v9 = vmax.f32 %v122_v51, 0.0  ;;  %v225_v25 = vld [vmem:[#allocation2 + $0x170] sm:$0xff]  ;;  %v240_v33 = vmul.f32 %v3976_v28, %v224_v15  ;;  %v414_v52 = vld [vmem:[#allocation5 + $0x58] sm:$0xff] }
  0x51   :  { %3448 = vmatpush3.bf16.msra.mxu0 %v3445_v42  ;;  %3322 = vmatprep.subr.bf16.mxu1 %v3321_v48  ;;  %v101_v42 = vmul.f32 %v3976_v28, %v79_v26  ;;  %v83_v8 = vld [vmem:[#allocation2 + $0x140] sm:$0xff]  ;;  %v125_v23 = vadd.f32 %v3981_v30, %v103_v62  ;;  %v140_v37 = vmax.f32 %v124_v10, 0.0  ;;  %v413_v51 = vld [vmem:[#allocation5 + $0x50] sm:$0xff] }
  0x52   :  { %3450 = vmatprep.subr.bf16.mxu0 %v3449_v50  ;;  %v137_v59 = vmax.f32 %v121_v41, 0.0  ;;  %v84_v18 = vld [vmem:[#allocation2 + $0x160] sm:$0xff]  ;;  %v105_v24 = vmul.f32 %v3976_v28, %v83_v8  ;;  %v227_v54 = vld [vmem:[#allocation2 + $0x1b0] sm:$0xff]  ;;  %v278_v8 = vld [vmem:[#allocation2 + $0x18] sm:$0xff]  ;;  %v3349_v10 = vpack.c.bf16 %v414_v52, %v413_v51 }
  0x53   :  { %v123_v61 = vadd.f32 %v3981_v30, %v101_v42  ;;  %v411_v31 = vld [vmem:[#allocation5 + $0x40] sm:$0xff]  ;;  %v106_v41 = vmul.f32 %v3976_v28, %v84_v18  ;;  %v226_v42 = vld [vmem:[#allocation2 + $0x190] sm:$0xff] }
  0x54   :  { %3324 = vmatpush3.bf16.msra.mxu1 %v3321_v48  ;;  %v236_v48 = vmul.f32 %v3976_v28, %v220_v34  ;;  %v85_v34 = vld [vmem:[#allocation2 + $0x180] sm:$0xff]  ;;  %v3345_v49 = vpack.c.bf16 %v412_v32, %v411_v31  ;;  %v242_v62 = vmul.f32 %v3976_v28, %v226_v42  ;;  %v1338_v32 = vld [vmem:[#allocation5 + $0x2e8] sm:$0xff] }
  0x55   :  { %3452 = vmatpush3.bf16.msra.mxu0 %v3449_v50  ;;  %3326 = vmatprep.subr.bf16.mxu1 %v3325_v60  ;;  %v136_v50 = vmax.f32 %v120_v29, 0.0  ;;  %v139_v19 = vmax.f32 %v123_v61, 0.0  ;;  %v4051_v29 = vadd.f32 %v3981_v30, %v238_v7  ;;  %v107_v53 = vmul.f32 %v3976_v28, %v85_v34  ;;  %v1336_v61 = vld [vmem:[#allocation5 + $0x2d8] sm:$0xff]  ;;  %v228_v7 = vld [vmem:[#allocation2 + $0x1d0] sm:$0xff]  ;;  %v1337_v31 = vld [vmem:[#allocation5 + $0x2e0] sm:$0xff] }
  0x56   :  { %3454 = vmatprep.subr.bf16.mxu0 %v3453_v63  ;;  %v4036_v3 = vadd.f32 %v3981_v30, %v236_v48  ;;  %v141_v48 = vmax.f32 %v125_v23, 0.0  ;;  %v128_v4 = vadd.f32 %v3981_v30, %v106_v41  ;;  %v149_v34 = vld [vmem:[#allocation2 + $0x8] sm:$0xff]  ;;  %v280_v41 = vld [vmem:[#allocation2 + $0x58] sm:$0xff]  ;;  %v3481_v51 = vpack.c.bf16 %v1338_v32, %v1337_v31 }
  0x57   :  { %v4698_v55 = vmax.f32 %v4051_v29, 0.0  ;;  %v129_v18 = vadd.f32 %v3981_v30, %v107_v53  ;;  %v417_v53 = vld [vmem:[#allocation5 + $0x70] sm:$0xff] }
  0x58   :  { %3328 = vmatpush3.bf16.msra.mxu1 %v3325_v60  ;;  %v3337_v60 = vpack.c.bf16 %v408_v47, %v407_v46  ;;  %v4699_v26 = vmax.f32 %v4036_v3, 0.0  ;;  %v241_v46 = vmul.f32 %v3976_v28, %v225_v25  ;;  %v86_v47 = vld [vmem:[#allocation2 + $0x1a0] sm:$0xff] }
  0x59   :  { %3456 = vmatpush3.bf16.msra.mxu0 %v3453_v63  ;;  %3330 = vmatprep.subr.bf16.mxu1 %v3329_v13  ;;  %v223_v63 = vld [vmem:[#allocation2 + $0x130] sm:$0xff]  ;;  %v108_v6 = vmul.f32 %v3976_v28, %v86_v47 }
  0x5a   :  { %3458 = vmatprep.subr.bf16.mxu0 %v3457_v17 }
  0x5b   :  { %2770 = vmatmul.mubr.f32.vlgmr.msra.gmra.mrb[0].mxu1 %v4705_v21 }
  0x5c   :  { %2994 = vmatmul.mubr.f32.vlgmr.msra.gmra.mrb[0].mxu0 %v134_v27  ;;  %3332 = vmatpush3.bf16.msra.mxu1 %v3329_v13  ;;  %v104_v13 = vmul.f32 %v3976_v28, %v82_v58  ;;  %v3469_v27 = vpack.c.bf16 %v1332_v12, %v1331_v11  ;;  %v4076_v11 = vadd.f32 %v3981_v30, %v241_v46 }
  0x5d   :  { %3460 = vmatpush3.bf16.msra.mxu0 %v3457_v17  ;;  %2772 = vmatprep.mubr.f32.mxu1 %v4704_v35  ;;  %v239_v17 = vmul.f32 %v3976_v28, %v223_v63  ;;  %v87_v63 = vld [vmem:[#allocation2 + $0x1c0] sm:$0xff]  ;;  %v243_v12 = vmul.f32 %v3976_v28, %v227_v54  ;;  %v418_v54 = vld [vmem:[#allocation5 + $0x78] sm:$0xff] }
  0x5e   :  { %2996 = vmatprep.mubr.f32.mxu0 %v135_v39  ;;  %3334 = vmatprep.subr.bf16.mxu1 %v3333_v40  ;;  %v126_v38 = vadd.f32 %v3981_v30, %v104_v13  ;;  %v1333_v39 = vld [vmem:[#allocation5 + $0x2c0] sm:$0xff]  ;;  %v109_v23 = vmul.f32 %v3976_v28, %v87_v63  ;;  %v4695_v42 = vmax.f32 %v4076_v11, 0.0  ;;  %v1339_v63 = vld [vmem:[#allocation5 + $0x2f0] sm:$0xff] }
  0x5f   :  { %2773 = vmatmul.mubr.f32.gmra.mrb[2].mxu1 %v4703_v43  ;;  %3462 = vmatprep.subr.bf16.mxu0 %v3461_v44  ;;  %v88_v13 = vld [vmem:[#allocation2 + $0x1e0] sm:$0xff]  ;;  %v4095_v47 = vadd.f32 %v3981_v30, %v243_v12 }
  0x60   :  { %2997 = vmatmul.mubr.f32.gmra.mrb[2].mxu0 %v136_v50  ;;  %3336 = vmatpush3.bf16.msra.mxu1 %v3333_v40  ;;  %v1334_v40 = vld [vmem:[#allocation5 + $0x2c8] sm:$0xff]  ;;  %v127_v50 = vadd.f32 %v3981_v30, %v105_v24  ;;  %v279_v24 = vld [vmem:[#allocation2 + $0x38] sm:$0xff]  ;;  %v131_v52 = vadd.f32 %v3981_v30, %v109_v23 }
  0x61   :  { %3464 = vmatpush3.bf16.msra.mxu0 %v3461_v44  ;;  %2775 = vmatprep.mubr.f32.mxu1 %v4702_v56  ;;  %v4059_v44 = vadd.f32 %v3981_v30, %v239_v17  ;;  %v3473_v58 = vpack.c.bf16 %v1334_v40, %v1333_v39  ;;  %v130_v39 = vadd.f32 %v3981_v30, %v108_v6  ;;  %v151_v6 = vld [vmem:[#allocation2 + $0x48] sm:$0xff]  ;;  %v734_v56 = vld [vmem:[#allocation5 + $0x138] sm:$0xff] }
  0x62   :  { %2999 = vmatprep.mubr.f32.mxu0 %v137_v59  ;;  %3338 = vmatprep.subr.bf16.mxu1 %v3337_v60  ;;  %v4068_v59 = vadd.f32 %v3981_v30, %v240_v33  ;;  %v143_v15 = vmax.f32 %v127_v50, 0.0  ;;  %v244_v33 = vmul.f32 %v3976_v28, %v228_v7  ;;  %v110_v40 = vmul.f32 %v3976_v28, %v88_v13  ;;  %v152_v23 = vld [vmem:[#allocation2 + $0x68] sm:$0xff] }
  0x63   :  { %2776 = vmatmul.mubr.f32.gmra.mrb[4].mxu1 %v4701_v1  ;;  %3466 = vmatprep.subr.bf16.mxu0 %v3465_v2  ;;  %v295_v50 = vmul.f32 %v3976_v28, %v279_v24  ;;  %v296_v7 = vmul.f32 %v3976_v28, %v280_v41  ;;  %v1512_v41 = vld [vmem:[#allocation5 + $0x308] sm:$0xff]  ;;  %v733_v1 = vld [vmem:[#allocation5 + $0x130] sm:$0xff] }
  0x64   :  { %3000 = vmatmul.mubr.f32.gmra.mrb[4].mxu0 %v138_v9  ;;  %3340 = vmatpush3.bf16.msra.mxu1 %v3337_v60  ;;  %v1335_v60 = vld [vmem:[#allocation5 + $0x2d0] sm:$0xff]  ;;  %v4697_v9 = vmax.f32 %v4059_v44, 0.0  ;;  %v4696_v25 = vmax.f32 %v4068_v59, 0.0  ;;  %v132_v12 = vadd.f32 %v3981_v30, %v110_v40  ;;  %v1511_v40 = vld [vmem:[#allocation5 + $0x300] sm:$0xff] }
  0x65   :  { %3468 = vmatpush3.bf16.msra.mxu0 %v3465_v2  ;;  %2778 = vmatprep.mubr.f32.mxu1 %v4700_v16  ;;  %v142_v2 = vmax.f32 %v126_v38, 0.0  ;;  %v3477_v17 = vpack.c.bf16 %v1336_v61, %v1335_v60  ;;  %v144_v38 = vmax.f32 %v128_v4, 0.0  ;;  %v281_v60 = vld [vmem:[#allocation2 + $0x78] sm:$0xff] }
  0x66   :  { %3002 = vmatprep.mubr.f32.mxu0 %v139_v19  ;;  %3342 = vmatprep.subr.bf16.mxu1 %v3341_v20  ;;  %v415_v19 = vld [vmem:[#allocation5 + $0x60] sm:$0xff]  ;;  %v297_v24 = vmul.f32 %v3976_v28, %v281_v60  ;;  %v284_v60 = vld [vmem:[#allocation2 + $0xd8] sm:$0xff] }
  0x67   :  { %2779 = vmatmul.mubr.f32.gmra.mrb[6].mxu1 %v4699_v26  ;;  %3470 = vmatprep.subr.bf16.mxu0 %v3469_v27 }
  0x68   :  { %3003 = vmatmul.mubr.f32.gmra.mrb[6].mxu0 %v140_v37  ;;  %3344 = vmatpush3.bf16.msra.mxu1 %v3341_v20  ;;  %v416_v20 = vld [vmem:[#allocation5 + $0x68] sm:$0xff]  ;;  %v294_v37 = vmul.f32 %v3976_v28, %v278_v8  ;;  %v146_v8 = vmax.f32 %v130_v39, 0.0 }
  0x69   :  { %3472 = vmatpush3.bf16.msra.mxu0 %v3469_v27  ;;  %2781 = vmatprep.mubr.f32.mxu1 %v4721_v0  ;;  %v4085_v27 = vadd.f32 %v3981_v30, %v242_v62  ;;  %v3353_v46 = vpack.c.bf16 %v416_v20, %v415_v19  ;;  %v4104_v62 = vadd.f32 %v3981_v30, %v244_v33  ;;  %v727_v33 = vld [vmem:[#allocation5 + $0x100] sm:$0xff] }
  0x6a   :  { %3005 = vmatprep.mubr.f32.mxu0 %v141_v48  ;;  %3346 = vmatprep.subr.bf16.mxu1 %v3345_v49  ;;  %v150_v48 = vld [vmem:[#allocation2 + $0x28] sm:$0xff]  ;;  %v310_v4 = vadd.f32 %v3981_v30, %v294_v37  ;;  %v3357_v19 = vpack.c.bf16 %v418_v54, %v417_v53  ;;  %v311_v20 = vadd.f32 %v3981_v30, %v295_v50  ;;  %v283_v37 = vld [vmem:[#allocation2 + $0xb8] sm:$0xff]  ;;  %v4127_v53 = vrot.slane %v4721_v0, 7 }
  0x6b   :  { %2782 = vmatmul.mubr.f32.gmra.mrb[8].mxu1 %v4698_v55  ;;  %3474 = vmatprep.subr.bf16.mxu0 %v3473_v58  ;;  %v4694_v61 = vmax.f32 %v4085_v27, 0.0  ;;  %v166_v13 = vmul.f32 %v3976_v28, %v150_v48  ;;  %v312_v48 = vadd.f32 %v3981_v30, %v296_v7  ;;  %v153_v50 = vld [vmem:[#allocation2 + $0x88] sm:$0xff]  ;;  %v2088_v7 = vld [vmem:[#allocation2 + $0xa0] sm:$0xff] }
  0x6c   :  { %3006 = vmatmul.mubr.f32.gmra.mrb[8].mxu0 %v142_v2  ;;  %3348 = vmatpush3.bf16.msra.mxu1 %v3345_v49  ;;  %v145_v49 = vmax.f32 %v129_v18, 0.0  ;;  %v1340_v2 = vld [vmem:[#allocation5 + $0x2f8] sm:$0xff]  ;;  %v4693_v18 = vmax.f32 %v4095_v47, 0.0  ;;  %v4122_v39 = vmax.f32 %v310_v4, 0.0  ;;  %v313_v4 = vadd.f32 %v3981_v30, %v297_v24 }
  0x6d   :  { %3476 = vmatpush3.bf16.msra.mxu0 %v3473_v58  ;;  %2784 = vmatprep.mubr.f32.mxu1 %v4697_v9  ;;  %v165_v58 = vmul.f32 %v3976_v28, %v149_v34  ;;  %v3485_v31 = vpack.c.bf16 %v1340_v2, %v1339_v63  ;;  %v167_v34 = vmul.f32 %v3976_v28, %v151_v6  ;;  %v4135_v2 = vmax.f32 %v311_v20, 0.0 }
  0x6e   :  { %3008 = vmatprep.mubr.f32.mxu0 %v143_v15  ;;  %3350 = vmatprep.subr.bf16.mxu1 %v3349_v10  ;;  %v282_v15 = vld [vmem:[#allocation2 + $0x98] sm:$0xff]  ;;  %v4130_v54 = vadd.f32 %v3981_v30, %v166_v13  ;;  %v299_v6 = vmul.f32 %v3976_v28, %v283_v37  ;;  %v729_v13 = vld [vmem:[#allocation5 + $0x110] sm:$0xff]  ;;  %v169_v20 = vmul.f32 %v3976_v28, %v153_v50  ;;  %v4152_v24 = vmax.f32 %v312_v48, 0.0  ;;  %v155_v37 = vld [vmem:[#allocation2 + $0xc8] sm:$0xff] }
  0x6f   :  { %2785 = vmatmul.mubr.f32.gmra.mrb[10].mxu1 %v4696_v25  ;;  %3478 = vmatprep.subr.bf16.mxu0 %v3477_v17  ;;  %v4116_v32 = vadd.f32 %v3981_v30, %v165_v58  ;;  %v168_v58 = vmul.f32 %v3976_v28, %v152_v23  ;;  %v4716_v23 = vrot.slane %v4122_v39, 7  ;;  %v4714_v48 = vrot.slane %v4135_v2, 7 }
  0x70   :  { %3009 = vmatmul.mubr.f32.gmra.mrb[10].mxu0 %v144_v38  ;;  %3352 = vmatpush3.bf16.msra.mxu1 %v3349_v10  ;;  %v147_v10 = vmax.f32 %v131_v52, 0.0  ;;  %v4692_v38 = vmax.f32 %v4104_v62, 0.0  ;;  %v148_v52 = vmax.f32 %v132_v12, 0.0  ;;  %v4146_v12 = vadd.f32 %v3981_v30, %v167_v34 }
  0x71   :  { %3480 = vmatpush3.bf16.msra.mxu0 %v3477_v17  ;;  %2787 = vmatprep.mubr.f32.mxu1 %v4695_v42  ;;  %v728_v17 = vld [vmem:[#allocation5 + $0x108] sm:$0xff]  ;;  %v300_v34 = vmul.f32 %v3976_v28, %v284_v60  ;;  %v171_v42 = vmul.f32 %v3976_v28, %v155_v37 }
  0x72   :  { %3011 = vmatprep.mubr.f32.mxu0 %v145_v49  ;;  %3354 = vmatprep.subr.bf16.mxu1 %v3353_v46  ;;  %v298_v49 = vmul.f32 %v3976_v28, %v282_v15  ;;  %v3361_v63 = vpack.c.bf16 %v728_v17, %v727_v33  ;;  %v730_v15 = vld [vmem:[#allocation5 + $0x118] sm:$0xff] }
  0x73   :  { %2788 = vmatmul.mubr.f32.gmra.mrb[12].mxu1 %v4694_v61  ;;  %3482 = vmatprep.subr.bf16.mxu0 %v3481_v51  ;;  %v1514_v33 = vld [vmem:[#allocation5 + $0x318] sm:$0xff]  ;;  %v732_v61 = vld [vmem:[#allocation5 + $0x128] sm:$0xff] }
  0x74   :  { %3012 = vmatmul.mubr.f32.gmra.mrb[12].mxu0 %v146_v8  ;;  %3356 = vmatpush3.bf16.msra.mxu1 %v3353_v46  ;;  %v154_v46 = vld [vmem:[#allocation2 + $0xa8] sm:$0xff]  ;;  %v3489_v8 = vpack.c.bf16 %v1512_v41, %v1511_v40  ;;  %v314_v17 = vadd.f32 %v3981_v30, %v298_v49  ;;  %v4708_v40 = vmax.f32 %v4130_v54, 0.0  ;;  %v4158_v41 = vadd.f32 %v3981_v30, %v168_v58 }
  0x75   :  { %3484 = vmatpush3.bf16.msra.mxu0 %v3481_v51  ;;  %2790 = vmatprep.mubr.f32.mxu1 %v4693_v18  ;;  %v4709_v51 = vmax.f32 %v4116_v32, 0.0  ;;  %v170_v50 = vmul.f32 %v3976_v28, %v154_v46  ;;  %v3365_v49 = vpack.c.bf16 %v730_v15, %v729_v13  ;;  %v4165_v18 = vmax.f32 %v313_v4, 0.0  ;;  %v731_v46 = vld [vmem:[#allocation5 + $0x120] sm:$0xff]  ;;  %v287_v13 = vld [vmem:[#allocation2 + $0x138] sm:$0xff] }
  0x76   :  { %3014 = vmatprep.mubr.f32.mxu0 %v147_v10  ;;  %3358 = vmatprep.subr.bf16.mxu1 %v3357_v19  ;;  %v1513_v10 = vld [vmem:[#allocation5 + $0x310] sm:$0xff]  ;;  %v4706_v58 = vmax.f32 %v4146_v12, 0.0  ;;  %v4711_v4 = vrot.slane %v4152_v24, 7  ;;  %v1515_v15 = vld [vmem:[#allocation5 + $0x320] sm:$0xff]  ;;  %v4707_v37 = vmax.f32 %v4158_v41, 0.0  ;;  %v303_v16 = vmul.f32 %v3976_v28, %v287_v13 }
  0x77   :  { %2791 = vmatmul.mubr.f32.gmra.mrb[14].mxu1 %v4692_v38  ;;  %3486 = vmatprep.subr.bf16.mxu0 %v3485_v31  ;;  %v286_v38 = vld [vmem:[#allocation2 + $0x118] sm:$0xff]  ;;  %4742 = vst [vmem:[#allocation15_spill] sm:$0xff] %v4165_v18  ;;  %v3493_v60 = vpack.c.bf16 %v1514_v33, %v1513_v10  ;;  %v1516_v10 = vld [vmem:[#allocation5 + $0x328] sm:$0xff]  ;;  %v4188_v9 = vadd.f32 %v3981_v30, %v170_v50  ;;  %v1517_v13 = vld [vmem:[#allocation5 + $0x330] sm:$0xff] }
  0x78   :  { %3015 = vmatmul.mubr.f32.gmra.mrb[14].mxu0 %v148_v52  ;;  %3360 = vmatpush3.bf16.msra.mxu1 %v3357_v19  ;;  %v315_v19 = vadd.f32 %v3981_v30, %v299_v6  ;;  %v156_v52 = vld [vmem:[#allocation2 + $0xe8] sm:$0xff]  ;;  %v4180_v6 = vmax.f32 %v314_v17, 0.0  ;;  %v302_v25 = vmul.f32 %v3976_v28, %v286_v38  ;;  %v288_v17 = vld [vmem:[#allocation2 + $0x158] sm:$0xff]  ;;  %v4710_v38 = vrot.slane %v4165_v18, 7 }
  0x79   :  { %3488 = vmatpush3.bf16.msra.mxu0 %v3485_v31  ;;  %2825 = vmatprep.mubr.msk.f32.mxu1 %vm4140_vm1, %v4127_v53  ;;  %v4172_v31 = vadd.f32 %v3981_v30, %v169_v20  ;;  %v316_v20 = vadd.f32 %v3981_v30, %v300_v34  ;;  %v157_v33 = vld [vmem:[#allocation2 + $0x108] sm:$0xff]  ;;  %v172_v55 = vmul.f32 %v3976_v28, %v156_v52 }
  0x7a   :  { %3049 = vmatprep.mubr.f32.mxu0 %v4709_v51  ;;  %3362 = vmatprep.subr.bf16.mxu1 %v3361_v63  ;;  %v3369_v34 = vpack.c.bf16 %v732_v61, %v731_v46  ;;  %v4196_v26 = vmax.f32 %v315_v19, 0.0  ;;  %v4203_v52 = vadd.f32 %v3981_v30, %v171_v42  ;;  %v173_v43 = vmul.f32 %v3976_v28, %v157_v33  ;;  %v289_v61 = vld [vmem:[#allocation2 + $0x178] sm:$0xff]  ;;  %v735_v51 = vld [vmem:[#allocation5 + $0x140] sm:$0xff] }
  0x7b   :  { %2826 = vmatmul.mubr.msk.f32.vlgmr.msra.gmra.mrb[0].mxu1 %vm4140_vm1, %v4716_v23  ;;  %3490 = vmatprep.subr.bf16.mxu0 %v3489_v8  ;;  %v4712_v50 = vmax.f32 %v4172_v31, 0.0  ;;  %v4713_v19 = vrot.slane %v4180_v6, 7  ;;  %v4211_v46 = vmax.f32 %v316_v20, 0.0  ;;  %v318_v42 = vadd.f32 %v3981_v30, %v302_v25  ;;  %v290_v20 = vld [vmem:[#allocation2 + $0x198] sm:$0xff] }
  0x7c   :  { %3050 = vmatmul.mubr.f32.vlgmr.msra.gmra.mrb[0].mxu0 %v4708_v40  ;;  %3364 = vmatpush3.bf16.msra.mxu1 %v3361_v63  ;;  %v158_v63 = vld [vmem:[#allocation2 + $0x128] sm:$0xff]  ;;  %v304_v35 = vmul.f32 %v3976_v28, %v288_v17  ;;  %v4715_v33 = vmax.f32 %v4188_v9, 0.0  ;;  %v4219_v21 = vadd.f32 %v3981_v30, %v172_v55  ;;  %v4717_v25 = vrot.slane %v4196_v26, 7 }
  0x7d   :  { %3492 = vmatpush3.bf16.msra.mxu0 %v3489_v8  ;;  %2828 = vmatprep.mubr.msk.f32.mxu1 %vm4140_vm1, %v4714_v48  ;;  %v3497_v8 = vpack.c.bf16 %v1516_v10, %v1515_v15  ;;  %v1518_v15 = vld [vmem:[#allocation5 + $0x338] sm:$0xff]  ;;  %v159_v10 = vld [vmem:[#allocation2 + $0x148] sm:$0xff]  ;;  %v3373_v17 = vpack.c.bf16 %v734_v56, %v733_v1  ;;  %v305_v40 = vmul.f32 %v3976_v28, %v289_v61  ;;  %v4718_v55 = vmax.f32 %v4203_v52, 0.0  ;;  %v1519_v61 = vld [vmem:[#allocation5 + $0x340] sm:$0xff] }
  0x7e   :  { %3052 = vmatprep.mubr.f32.mxu0 %v4706_v58  ;;  %3366 = vmatprep.subr.bf16.mxu1 %v3365_v49  ;;  %v174_v58 = vmul.f32 %v3976_v28, %v158_v63  ;;  %v4233_v63 = vadd.f32 %v3981_v30, %v173_v43  ;;  %v291_v56 = vld [vmem:[#allocation2 + $0x1b8] sm:$0xff]  ;;  %v4719_v1 = vrot.slane %v4211_v46, 7  ;;  %v320_v43 = vadd.f32 %v3981_v30, %v304_v35 }
  0x7f   :  { %2829 = vmatmul.mubr.msk.f32.gmra.mrb[2].mxu1 %vm4140_vm1, %v4711_v4  ;;  %3494 = vmatprep.subr.bf16.mxu0 %v3493_v60  ;;  %v175_v4 = vmul.f32 %v3976_v28, %v159_v10  ;;  %v4720_v10 = vmax.f32 %v4219_v21, 0.0  ;;  %v307_v23 = vmul.f32 %v3976_v28, %v291_v56 }
  0x80   :  { %3053 = vmatmul.mubr.f32.gmra.mrb[2].mxu0 %v4707_v37  ;;  %3368 = vmatpush3.bf16.msra.mxu1 %v3365_v49  ;;  %v319_v37 = vadd.f32 %v3981_v30, %v303_v16  ;;  %v160_v49 = vld [vmem:[#allocation2 + $0x168] sm:$0xff]  ;;  %v4241_v16 = vmax.f32 %v318_v42, 0.0  ;;  %v292_v42 = vld [vmem:[#allocation2 + $0x1d8] sm:$0xff] }
  0x81   :  { %3496 = vmatpush3.bf16.msra.mxu0 %v3493_v60  ;;  %2831 = vmatprep.mubr.msk.f32.mxu1 %vm4140_vm1, %v4710_v38  ;;  %v3501_v60 = vpack.c.bf16 %v1518_v15, %v1517_v13  ;;  %v736_v38 = vld [vmem:[#allocation5 + $0x148] sm:$0xff]  ;;  %v176_v48 = vmul.f32 %v3976_v28, %v160_v49  ;;  %v4264_v49 = vadd.f32 %v3981_v30, %v175_v4 }
  0x82   :  { %3055 = vmatprep.mubr.f32.mxu0 %v4712_v50  ;;  %3370 = vmatprep.subr.bf16.mxu1 %v3369_v34  ;;  %v1520_v13 = vld [vmem:[#allocation5 + $0x348] sm:$0xff]  ;;  %v306_v50 = vmul.f32 %v3976_v28, %v290_v20  ;;  %v3377_v35 = vpack.c.bf16 %v736_v38, %v735_v51  ;;  %v4256_v20 = vmax.f32 %v319_v37, 0.0  ;;  %v4724_v51 = vrot.slane %v4241_v16, 7  ;;  %v737_v37 = vld [vmem:[#allocation5 + $0x150] sm:$0xff]  ;;  %v738_v38 = vld [vmem:[#allocation5 + $0x158] sm:$0xff] }
  0x83   :  { %2832 = vmatmul.mubr.msk.f32.gmra.mrb[4].mxu1 %vm4140_vm1, %v4713_v19  ;;  %3498 = vmatprep.subr.bf16.mxu0 %v3497_v8  ;;  %v161_v15 = vld [vmem:[#allocation2 + $0x188] sm:$0xff]  ;;  %v4249_v19 = vadd.f32 %v3981_v30, %v174_v58  ;;  %v4723_v58 = vmax.f32 %v4233_v63, 0.0  ;;  %v308_v4 = vmul.f32 %v3976_v28, %v292_v42  ;;  %v3381_v0 = vpack.c.bf16 %v738_v38, %v737_v37 }
  0x84   :  { %3056 = vmatmul.mubr.f32.gmra.mrb[4].mxu0 %v4715_v33  ;;  %3372 = vmatpush3.bf16.msra.mxu1 %v3369_v34  ;;  %v321_v33 = vadd.f32 %v3981_v30, %v305_v40  ;;  %v162_v34 = vld [vmem:[#allocation2 + $0x1a8] sm:$0xff]  ;;  %v4272_v40 = vmax.f32 %v320_v43, 0.0  ;;  %v322_v56 = vadd.f32 %v3981_v30, %v306_v50 }
  0x85   :  { %3500 = vmatpush3.bf16.msra.mxu0 %v3497_v8  ;;  %2834 = vmatprep.mubr.msk.f32.mxu1 %vm4140_vm1, %v4717_v25  ;;  %v3505_v8 = vpack.c.bf16 %v1520_v13, %v1519_v61  ;;  %v177_v25 = vmul.f32 %v3976_v28, %v161_v15  ;;  %v163_v61 = vld [vmem:[#allocation2 + $0x1c8] sm:$0xff]  ;;  %v4726_v13 = vmax.f32 %v4249_v19, 0.0  ;;  %v4280_v15 = vadd.f32 %v3981_v30, %v176_v48 }
  0x86   :  { %3058 = vmatprep.mubr.f32.mxu0 %v4718_v55  ;;  %3374 = vmatprep.subr.bf16.mxu1 %v3373_v17  ;;  %v1521_v55 = vld [vmem:[#allocation5 + $0x350] sm:$0xff]  ;;  %v178_v43 = vmul.f32 %v3976_v28, %v162_v34  ;;  %v4287_v42 = vmax.f32 %v321_v33, 0.0  ;;  %v4725_v48 = vmax.f32 %v4264_v49, 0.0  ;;  %v179_v34 = vmul.f32 %v3976_v28, %v163_v61  ;;  %v740_v50 = vld [vmem:[#allocation5 + $0x168] sm:$0xff]  ;;  %v1523_v61 = vld [vmem:[#allocation5 + $0x360] sm:$0xff] }
  0x87   :  { %2835 = vmatmul.mubr.msk.f32.gmra.mrb[6].mxu1 %vm4140_vm1, %v4719_v1  ;;  %3502 = vmatprep.subr.bf16.mxu0 %v3501_v60  ;;  %v1522_v1 = vld [vmem:[#allocation5 + $0x358] sm:$0xff]  ;;  %v4302_v33 = vmax.f32 %v322_v56, 0.0  ;;  %v324_v37 = vadd.f32 %v3981_v30, %v308_v4 }
  0x88   :  { %3059 = vmatmul.mubr.f32.gmra.mrb[6].mxu0 %v4720_v10  ;;  %3376 = vmatpush3.bf16.msra.mxu1 %v3373_v17  ;;  %v323_v17 = vadd.f32 %v3981_v30, %v307_v23  ;;  %v164_v10 = vld [vmem:[#allocation2 + $0x1e8] sm:$0xff]  ;;  %v3509_v23 = vpack.c.bf16 %v1522_v1, %v1521_v55  ;;  %v4309_v38 = vadd.f32 %v3981_v30, %v178_v43  ;;  %v4743_v55 = vrot.slane %v4256_v20, 7 }
  0x89   :  { %3504 = vmatpush3.bf16.msra.mxu0 %v3501_v60  ;;  %2837 = vmatprep.mubr.msk.f32.mxu1 %vm4140_vm1, %v4127_v53  ;;  %v4294_v60 = vadd.f32 %v3981_v30, %v177_v25  ;;  %v4728_v25 = vmax.f32 %v4280_v15, 0.0  ;;  %v180_v53 = vmul.f32 %v3976_v28, %v164_v10  ;;  %v4735_v1 = vrot.slane %v4287_v42, 7 }
  0x8a   :  { %3061 = vmatprep.mubr.f32.mxu0 %v4723_v58  ;;  %3378 = vmatprep.subr.bf16.mxu1 %v3377_v35  ;;  %v739_v58 = vld [vmem:[#allocation5 + $0x160] sm:$0xff]  ;;  %v4317_v56 = vmax.f32 %v323_v17, 0.0  ;;  %v4323_v43 = vadd.f32 %v3981_v30, %v179_v34  ;;  %v4744_v28 = vrot.slane %v4272_v40, 7  ;;  %v4734_v10 = vrot.slane %v4302_v33, 7  ;;  %v1525_v34 = vld [vmem:[#allocation5 + $0x370] sm:$0xff] }
  0x8b   :  { %2838 = vmatmul.mubr.msk.f32.gmra.mrb[8].mxu1 %vm4140_vm1, %v4724_v51  ;;  %3506 = vmatprep.subr.bf16.mxu0 %v3505_v8  ;;  %v1524_v51 = vld [vmem:[#allocation5 + $0x368] sm:$0xff]  ;;  %v3385_v4 = vpack.c.bf16 %v740_v50, %v739_v58  ;;  %v4330_v17 = vmax.f32 %v324_v37, 0.0  ;;  %v4729_v58 = vmax.f32 %v4309_v38, 0.0  ;;  %v4336_v50 = vadd.f32 %v3981_v30, %v180_v53 }
  0x8c   :  { %3062 = vmatmul.mubr.f32.gmra.mrb[8].mxu0 %v4726_v13  ;;  %3380 = vmatpush3.bf16.msra.mxu1 %v3377_v35  ;;  %v4727_v35 = vmax.f32 %v4294_v60, 0.0  ;;  %v1526_v13 = vld [vmem:[#allocation5 + $0x378] sm:$0xff] }
  0x8d   :  { %3508 = vmatpush3.bf16.msra.mxu0 %v3505_v8  ;;  %2840 = vmatprep.mubr.msk.f32.mxu1 %vm4140_vm1, %v4743_v55  ;;  %v3513_v8 = vpack.c.bf16 %v1524_v51, %v1523_v61  ;;  %v741_v55 = vld [vmem:[#allocation5 + $0x170] sm:$0xff]  ;;  %v4733_v51 = vrot.slane %v4317_v56, 7  ;;  %v4732_v30 = vrot.slane %v4330_v17, 7  ;;  %v3517_v53 = vpack.c.bf16 %v1526_v13, %v1525_v34  ;;  %v970_v61 = vld [vmem:[#allocation5 + $0x188] sm:$0xff] }
  0x8e   :  { %3064 = vmatprep.mubr.f32.mxu0 %v4725_v48  ;;  %3382 = vmatprep.subr.bf16.mxu1 %v3381_v0  ;;  %v742_v48 = vld [vmem:[#allocation5 + $0x178] sm:$0xff]  ;;  %v1691_v34 = vld [vmem:[#allocation5 + $0x390] sm:$0xff] }
  0x8f   :  { %2841 = vmatmul.mubr.msk.f32.gmra.mrb[10].mxu1 %vm4140_vm1, %v4744_v28  ;;  %3510 = vmatprep.subr.bf16.mxu0 %v3509_v23  ;;  %v3389_v37 = vpack.c.bf16 %v742_v48, %v741_v55  ;;  %v4731_v28 = vmax.f32 %v4336_v50, 0.0  ;;  %v285_v48 = vld [vmem:[#allocation2 + $0xf8] sm:$0xff]  ;;  %v971_v55 = vld [vmem:[#allocation5 + $0x190] sm:$0xff] }
  0x90   :  { %3065 = vmatmul.mubr.f32.gmra.mrb[10].mxu0 %v4728_v25  ;;  %3384 = vmatpush3.bf16.msra.mxu1 %v3381_v0  ;;  %v4730_v0 = vmax.f32 %v4323_v43, 0.0  ;;  %v1690_v25 = vld [vmem:[#allocation5 + $0x388] sm:$0xff] }
  0x91   :  { %3512 = vmatpush3.bf16.msra.mxu0 %v3509_v23  ;;  %2843 = vmatprep.mubr.msk.f32.mxu1 %vm4140_vm1, %v4735_v1  ;;  %v969_v23 = vld [vmem:[#allocation5 + $0x180] sm:$0xff]  ;;  %v1696_v1 = vld [vmem:[#allocation5 + $0x3b8] sm:$0xff] }
  0x92   :  { %3067 = vmatprep.mubr.f32.mxu0 %v4727_v35  ;;  %3386 = vmatprep.subr.bf16.mxu1 %v3385_v4  ;;  %v1689_v35 = vld [vmem:[#allocation5 + $0x380] sm:$0xff]  ;;  %v3393_v13 = vpack.c.bf16 %v970_v61, %v969_v23  ;;  %v4745_v61 = vmov 0.0  }
  0x93   :  { %2844 = vmatmul.mubr.msk.f32.gmra.mrb[12].mxu1 %vm4140_vm1, %v4734_v10  ;;  %3514 = vmatprep.subr.bf16.mxu0 %v3513_v8  ;;  %v4749_v10 = vrot.slane %v4165_v18, 7 }
  0x94   :  { %3068 = vmatmul.mubr.f32.gmra.mrb[12].mxu0 %v4729_v58  ;;  %3388 = vmatpush3.bf16.msra.mxu1 %v3385_v4  ;;  %v3521_v4 = vpack.c.bf16 %v1690_v25, %v1689_v35  ;;  %v1692_v58 = vld [vmem:[#allocation5 + $0x398] sm:$0xff]  ;;  %v4746_v25 = vrot.slane %v4122_v39, 7 }
  0x95   :  { %3516 = vmatpush3.bf16.msra.mxu0 %v3513_v8  ;;  %2846 = vmatprep.mubr.msk.f32.mxu1 %vm4140_vm1, %v4733_v51  ;;  %v972_v8 = vld [vmem:[#allocation5 + $0x198] sm:$0xff]  ;;  %v4747_v51 = vrot.slane %v4135_v2, 7 }
  0x96   :  { %3070 = vmatprep.mubr.f32.mxu0 %v4730_v0  ;;  %3390 = vmatprep.subr.bf16.mxu1 %v3389_v37  ;;  %v4369_v0 = vld [vmem:[%s4684_s1] ss:$0 sm:$0xff]  ;;  %v3397_v35 = vpack.c.bf16 %v972_v8, %v971_v55  ;;  %v975_v8 = vld [vmem:[#allocation5 + $0x1b0] sm:$0xff] }
  0x97   :  { %2847 = vmatmul.mubr.msk.f32.gmra.mrb[14].mxu1 %vm4140_vm1, %v4732_v30  ;;  %3518 = vmatprep.subr.bf16.mxu0 %v3517_v53  ;;  %v301_v23 = vmul.f32 %v4369_v0, %v285_v48  ;;  %v974_v30 = vld [vmem:[#allocation5 + $0x1a8] sm:$0xff] }
  0x98   :  { %3071 = vmatmul.mubr.f32.gmra.mrb[14].mxu0 %v4731_v28  ;;  %3392 = vmatpush3.bf16.msra.mxu1 %v3389_v37  ;;  %v3525_v37 = vpack.c.bf16 %v1692_v58, %v1691_v34  ;;  %v973_v28 = vld [vmem:[#allocation5 + $0x1a0] sm:$0xff]  ;;  %v1694_v48 = vld [vmem:[#allocation5 + $0x3a8] sm:$0xff]  ;;  %v4748_v58 = vrot.slane %v4152_v24, 7  ;;  %v976_v34 = vld [vmem:[#allocation5 + $0x1b8] sm:$0xff] }
  0x99   :  { %3520 = vmatpush3.bf16.msra.mxu0 %v3517_v53  ;;  %2881 = vmatprep.mubr.f32.mxu1 %v4745_v61  ;;  %v1693_v53 = vld [vmem:[#allocation5 + $0x3a0] sm:$0xff] }
  0x9a   :  { %3105 = vmatprep.mubr.msk.f32.mxu0 %vm4140_vm1, %v4746_v25  ;;  %3394 = vmatprep.subr.bf16.mxu1 %v3393_v13  ;;  %v4385_v25 = vld [vmem:[%s4685_s2] ss:$0 sm:$0xff] }
  0x9b   :  { %2882 = vmatmul.mubr.f32.vlgmr.msra.gmra.mrb[0].mxu1 %v4122_v39  ;;  %3522 = vmatprep.subr.bf16.mxu0 %v3521_v4  ;;  %v4388_v55 = vadd.f32 %v4385_v25, %v301_v23  ;;  %v1695_v23 = vld [vmem:[#allocation5 + $0x3b0] sm:$0xff] }
  0x9c   :  { %3106 = vmatmul.mubr.msk.f32.vlgmr.msra.gmra.mrb[0].mxu0 %vm4140_vm1, %v4747_v51  ;;  %3396 = vmatpush3.bf16.msra.mxu1 %v3393_v13  ;;  %v3401_v51 = vpack.c.bf16 %v974_v30, %v973_v28  ;;  %v3529_v13 = vpack.c.bf16 %v1694_v48, %v1693_v53  ;;  %v4750_v30 = vrot.slane %v4180_v6, 7  ;;  %v3405_v28 = vpack.c.bf16 %v976_v34, %v975_v8  ;;  %v293_v8 = vld [vmem:[#allocation2 + $0x1f8] sm:$0xff] }
  0x9d   :  { %3524 = vmatpush3.bf16.msra.mxu0 %v3521_v4  ;;  %2884 = vmatprep.mubr.f32.mxu1 %v4135_v2  ;;  %v4737_v4 = vmax.f32 %v4388_v55, 0.0  ;;  %v3533_v53 = vpack.c.bf16 %v1696_v1, %v1695_v23  ;;  %v4751_v48 = vrot.slane %v4196_v26, 7  ;;  %v4752_v34 = vrot.slane %v4211_v46, 7  ;;  %v979_v23 = vld [vmem:[#allocation5 + $0x1d0] sm:$0xff] }
  0x9e   :  { %3108 = vmatprep.mubr.msk.f32.mxu0 %vm4140_vm1, %v4748_v58  ;;  %3398 = vmatprep.subr.bf16.mxu1 %v3397_v35  ;;  %v1697_v58 = vld [vmem:[#allocation5 + $0x3c0] sm:$0xff] }
  0x9f   :  { %2885 = vmatmul.mubr.f32.gmra.mrb[2].mxu1 %v4152_v24  ;;  %3526 = vmatprep.subr.bf16.mxu0 %v3525_v37 }
  0xa0   :  { %3109 = vmatmul.mubr.msk.f32.gmra.mrb[2].mxu0 %vm4140_vm1, %v4749_v10  ;;  %3400 = vmatpush3.bf16.msra.mxu1 %v3397_v35  ;;  %v977_v10 = vld [vmem:[#allocation5 + $0x1c0] sm:$0xff]  ;;  %v978_v35 = vld [vmem:[#allocation5 + $0x1c8] sm:$0xff] }
  0xa1   :  { %3528 = vmatpush3.bf16.msra.mxu0 %v3525_v37  ;;  %2887 = vmatprep.mubr.f32.mxu1 %v4165_v18  ;;  %v1504_v37 = vrot.slane %v4737_v4, 7  ;;  %v1698_v18 = vld [vmem:[#allocation5 + $0x3c8] sm:$0xff]  ;;  %v3409_v1 = vpack.c.bf16 %v978_v35, %v977_v10  ;;  %v309_v4 = vmul.f32 %v4369_v0, %v293_v8  ;;  %v981_v35 = vld [vmem:[#allocation5 + $0x1e0] sm:$0xff]  ;;  %v4756_v8 = vrot.slane %v4272_v40, 7 }
  0xa2   :  { %3111 = vmatprep.mubr.msk.f32.mxu0 %vm4140_vm1, %v4750_v30  ;;  %3402 = vmatprep.subr.bf16.mxu1 %v3401_v51  ;;  %v980_v30 = vld [vmem:[#allocation5 + $0x1d8] sm:$0xff] }
  0xa3   :  { %2888 = vmatmul.mubr.f32.gmra.mrb[4].mxu1 %v4180_v6  ;;  %3530 = vmatprep.subr.bf16.mxu0 %v3529_v13 }
  0xa4   :  { %3112 = vmatmul.mubr.msk.f32.gmra.mrb[4].mxu0 %vm4140_vm1, %v4751_v48  ;;  %3404 = vmatpush3.bf16.msra.mxu1 %v3401_v51  ;;  %v3537_v51 = vpack.c.bf16 %v1698_v18, %v1697_v58  ;;  %v1700_v48 = vld [vmem:[#allocation5 + $0x3d8] sm:$0xff]  ;;  %v3413_v18 = vpack.c.bf16 %v980_v30, %v979_v23  ;;  %v4433_v58 = vadd.f32 %v4385_v25, %v309_v4 }
  0xa5   :  { %3532 = vmatpush3.bf16.msra.mxu0 %v3529_v13  ;;  %2890 = vmatprep.mubr.f32.mxu1 %v4196_v26  ;;  %v1699_v13 = vld [vmem:[#allocation5 + $0x3d0] sm:$0xff] }
  0xa6   :  { %3114 = vmatprep.mubr.msk.f32.mxu0 %vm4140_vm1, %v4752_v34  ;;  %3406 = vmatprep.subr.bf16.mxu1 %v3405_v28  ;;  %v4753_v34 = vrot.slane %v4241_v16, 7  ;;  %v3541_v10 = vpack.c.bf16 %v1700_v48, %v1699_v13  ;;  %4755 = vst [vmem:[#allocation16_spill] sm:$0xff] %v4433_v58  ;;  %v984_v13 = vld [vmem:[#allocation5 + $0x1f8] sm:$0xff]  ;;  %v4757_v48 = vrot.slane %v4287_v42, 7  ;;  %v4738_v4 = vmax.f32 %v4433_v58, 0.0  ;;  %v2101_v58 = vld [vmem:[#allocation7 + $0x10] sm:$0xff] }
  0xa7   :  { %2891 = vmatmul.mubr.f32.gmra.mrb[6].mxu1 %v4211_v46  ;;  %3534 = vmatprep.subr.bf16.mxu0 %v3533_v53 }
  0xa8   :  { %3115 = vmatmul.mubr.msk.f32.gmra.mrb[6].mxu0 %vm4140_vm1, %v1504_v37  ;;  %3408 = vmatpush3.bf16.msra.mxu1 %v3405_v28  ;;  %v982_v28 = vld [vmem:[#allocation5 + $0x1e8] sm:$0xff]  ;;  %v4754_v37 = vrot.slane %v4256_v20, 7 }
  0xa9   :  { %3536 = vmatpush3.bf16.msra.mxu0 %v3533_v53  ;;  %2893 = vmatprep.mubr.f32.mxu1 %v4745_v61  ;;  %v1701_v61 = vld [vmem:[#allocation5 + $0x3e0] sm:$0xff]  ;;  %v1702_v53 = vld [vmem:[#allocation5 + $0x3e8] sm:$0xff]  ;;  %v3417_v23 = vpack.c.bf16 %v982_v28, %v981_v35  ;;  %v4758_v35 = vrot.slane %v4302_v33, 7 }
  0xaa   :  { %3117 = vmatprep.mubr.msk.f32.mxu0 %vm4140_vm1, %v4753_v34  ;;  %3410 = vmatprep.subr.bf16.mxu1 %v3409_v1  ;;  %v3545_v30 = vpack.c.bf16 %v1702_v53, %v1701_v61  ;;  %v1704_v34 = vld [vmem:[#allocation5 + $0x3f8] sm:$0xff]  ;;  %v1867_v61 = vld [vmem:[#allocation5 + $0x400] sm:$0xff]  ;;  %v4759_v53 = vrot.slane %v4317_v56, 7 }
  0xab   :  { %2894 = vmatmul.mubr.f32.gmra.mrb[8].mxu1 %v4241_v16  ;;  %3538 = vmatprep.subr.bf16.mxu0 %v3537_v51 }
  0xac   :  { %3118 = vmatmul.mubr.msk.f32.gmra.mrb[8].mxu0 %vm4140_vm1, %v4754_v37  ;;  %3412 = vmatpush3.bf16.msra.mxu1 %v3409_v1  ;;  %v983_v1 = vld [vmem:[#allocation5 + $0x1f0] sm:$0xff] }
  0xad   :  { %3540 = vmatpush3.bf16.msra.mxu0 %v3537_v51  ;;  %2896 = vmatprep.mubr.f32.mxu1 %v4256_v20  ;;  %v1703_v51 = vld [vmem:[#allocation5 + $0x3f0] sm:$0xff]  ;;  %v3421_v28 = vpack.c.bf16 %v984_v13, %v983_v1  ;;  %v4761_v13 = vrot.slane %v4330_v17, 7 }
  0xae   :  { %3120 = vmatprep.mubr.msk.f32.mxu0 %vm4140_vm1, %v4756_v8  ;;  %3414 = vmatprep.subr.bf16.mxu1 %v3413_v18  ;;  %v3549_v37 = vpack.c.bf16 %v1704_v34, %v1703_v51  ;;  %v2099_v8 = vld [vmem:[#allocation7] sm:$0xff] }
  0xaf   :  { %2897 = vmatmul.mubr.f32.gmra.mrb[10].mxu1 %v4272_v40  ;;  %3542 = vmatprep.subr.bf16.mxu0 %v3541_v10 }
  0xb0   :  { %3121 = vmatmul.mubr.msk.f32.gmra.mrb[10].mxu0 %vm4140_vm1, %v4757_v48  ;;  %3416 = vmatpush3.bf16.msra.mxu1 %v3413_v18  ;;  %v1868_v18 = vld [vmem:[#allocation5 + $0x408] sm:$0xff] }
  0xb1   :  { %3544 = vmatpush3.bf16.msra.mxu0 %v3541_v10  ;;  %2899 = vmatprep.mubr.f32.mxu1 %v4287_v42  ;;  %v1505_v10 = vrot.slane %v4738_v4, 7  ;;  %v2100_v48 = vld [vmem:[#allocation7 + $0x8] sm:$0xff]  ;;  %v3553_v51 = vpack.c.bf16 %v1868_v18, %v1867_v61  ;;  %v1869_v4 = vld [vmem:[#allocation5 + $0x410] sm:$0xff]  ;;  %v4764_v61 = vmax.f32 %v3990_v5, 0.0  ;;  %v2103_v5 = vld [vmem:[#allocation7 + $0x20] sm:$0xff] }
  0xb2   :  { %3123 = vmatprep.mubr.msk.f32.mxu0 %vm4140_vm1, %v4758_v35  ;;  %3418 = vmatprep.subr.bf16.mxu1 %v3417_v23  ;;  %v4760_v35 = vmax.f32 %v4116_v32, 0.0  ;;  %v1870_v32 = vld [vmem:[#allocation5 + $0x418] sm:$0xff] }
  0xb3   :  { %2900 = vmatmul.mubr.f32.gmra.mrb[12].mxu1 %v4302_v33  ;;  %3546 = vmatprep.subr.bf16.mxu0 %v3545_v30  ;;  %v3557_v18 = vpack.c.bf16 %v1870_v32, %v1869_v4  ;;  %v2104_v4 = vld [vmem:[#allocation7 + $0x28] sm:$0xff] }
  0xb4   :  { %3124 = vmatmul.mubr.msk.f32.gmra.mrb[12].mxu0 %vm4140_vm1, %v4759_v53  ;;  %3420 = vmatpush3.bf16.msra.mxu1 %v3417_v23  ;;  %v920_v1 = vrot.slane %v4760_v35, 7  ;;  %v4762_v23 = vmax.f32 %v4130_v54, 0.0  ;;  %v3585_v53 = vpack.c.bf16 %v2100_v48, %v2099_v8  ;;  %v221_v54 = vld [vmem:[#allocation2 + $0xf0] sm:$0xff]  ;;  %v4765_v8 = vmax.f32 %v4158_v41, 0.0  ;;  %v1872_v48 = vld [vmem:[#allocation5 + $0x428] sm:$0xff] }
  0xb5   :  { %3548 = vmatpush3.bf16.msra.mxu0 %v3545_v30  ;;  %2902 = vmatprep.mubr.f32.mxu1 %v4317_v56  ;;  %v4763_v30 = vmax.f32 %v4146_v12, 0.0  ;;  %v237_v41 = vmul.f32 %v4369_v0, %v221_v54 }
  0xb6   :  { %3126 = vmatprep.mubr.msk.f32.mxu0 %vm4140_vm1, %v4761_v13  ;;  %3422 = vmatprep.subr.bf16.mxu1 %v3421_v28  ;;  %v921_v34 = vrot.slane %v4762_v23, 7  ;;  %v2102_v13 = vld [vmem:[#allocation7 + $0x18] sm:$0xff]  ;;  %v923_v12 = vrot.slane %v4765_v8, 7 }
  0xb7   :  { %2903 = vmatmul.mubr.f32.gmra.mrb[14].mxu1 %v4330_v17  ;;  %3550 = vmatprep.subr.bf16.mxu0 %v3549_v37  ;;  %v922_v35 = vrot.slane %v4763_v30, 7  ;;  %v1873_v30 = vld [vmem:[#allocation5 + $0x430] sm:$0xff] }
  0xb8   :  { %3127 = vmatmul.mubr.msk.f32.gmra.mrb[14].mxu0 %vm4140_vm1, %v1505_v10  ;;  %3424 = vmatpush3.bf16.msra.mxu1 %v3421_v28  ;;  %v3589_v28 = vpack.c.bf16 %v2102_v13, %v2101_v58  ;;  %v1871_v10 = vld [vmem:[#allocation5 + $0x420] sm:$0xff]  ;;  %v4770_v13 = vmax.f32 %v4203_v52, 0.0  ;;  %v4773_v52 = vmax.f32 %v4219_v21, 0.0  ;;  %v2108_v21 = vld [vmem:[#allocation7 + $0x48] sm:$0xff] }
  0xb9   :  { %3552 = vmatpush3.bf16.msra.mxu0 %v3549_v37  ;;  %2937 = vmatprep.mubr.msk.f32.mxu1 %vm4140_vm1, %v920_v1  ;;  %v4766_v37 = vmax.f32 %v4172_v31, 0.0  ;;  %v4767_v1 = vmax.f32 %v3996_v14, 0.0  ;;  %v3561_v58 = vpack.c.bf16 %v1872_v48, %v1871_v10  ;;  %v4769_v31 = vmax.f32 %v4188_v9, 0.0  ;;  %v2105_v9 = vld [vmem:[#allocation7 + $0x30] sm:$0xff]  ;;  %v1875_v10 = vld [vmem:[#allocation5 + $0x440] sm:$0xff]  ;;  %v1876_v48 = vld [vmem:[#allocation5 + $0x448] sm:$0xff] }
  0xba   :  { %3161 = vmatprep.mubr.f32.mxu0 %v4764_v61  ;;  %3554 = vmatprep.subr.bf16.mxu0 %v3553_v51  ;;  %v3593_v14 = vpack.c.bf16 %v2104_v4, %v2103_v5  ;;  %v926_v54 = vrot.slane %v4770_v13, 7  ;;  %v4772_v61 = vmax.f32 %v4019_v45, 0.0  ;;  %v3569_v5 = vpack.c.bf16 %v1876_v48, %v1875_v10  ;;  %v1882_v10 = vld [vmem:[#allocation5 + $0x478] sm:$0xff] }
  0xbb   :  { %2938 = vmatmul.mubr.msk.f32.vlgmr.msra.gmra.mrb[0].mxu1 %vm4140_vm1, %v921_v34  ;;  %3586 = vmatprep.subr.bf16.mxu1 %v3585_v53  ;;  %v924_v23 = vrot.slane %v4766_v37, 7  ;;  %v4768_v34 = vmax.f32 %v4003_v22, 0.0  ;;  %v925_v32 = vrot.slane %v4769_v31, 7  ;;  %v253_v22 = vadd.f32 %v4385_v25, %v237_v41  ;;  %v1877_v41 = vld [vmem:[#allocation5 + $0x450] sm:$0xff] }
  0xbc   :  { %3162 = vmatmul.mubr.f32.vlgmr.msra.gmra.mrb[0].mxu0 %v4767_v1  ;;  %2940 = vmatprep.mubr.msk.f32.mxu1 %vm4140_vm1, %v922_v35  ;;  %v1874_v35 = vld [vmem:[#allocation5 + $0x438] sm:$0xff]  ;;  %v4774_v37 = vmax.f32 %v4233_v63, 0.0  ;;  %v4776_v1 = vmax.f32 %v4036_v3, 0.0  ;;  %v4777_v4 = vmax.f32 %v4249_v19, 0.0  ;;  %v4778_v31 = vmax.f32 %v4264_v49, 0.0  ;;  %v2109_v3 = vld [vmem:[#allocation7 + $0x50] sm:$0xff] }
  0xbd   :  { %3556 = vmatpush3.bf16.msra.mxu0 %v3553_v51  ;;  %3164 = vmatprep.mubr.f32.mxu0 %v4768_v34  ;;  %v4771_v51 = vmax.f32 %v4010_v36, 0.0  ;;  %v3565_v8 = vpack.c.bf16 %v1874_v35, %v1873_v30  ;;  %v269_v45 = vmax.f32 %v253_v22, 0.0  ;;  %v1878_v34 = vld [vmem:[#allocation5 + $0x458] sm:$0xff]  ;;  %v4779_v19 = vmax.f32 %v4051_v29, 0.0 }
  0xbe   :  { %3588 = vmatpush3.bf16.msra.mxu1 %v3585_v53  ;;  %3558 = vmatprep.subr.bf16.mxu0 %v3557_v18  ;;  %v2106_v53 = vld [vmem:[#allocation7 + $0x38] sm:$0xff]  ;;  %v929_v63 = vrot.slane %v4777_v4, 7  ;;  %v3573_v30 = vpack.c.bf16 %v1878_v34, %v1877_v41  ;;  %v4780_v35 = vmax.f32 %v4280_v15, 0.0  ;;  %v4781_v22 = vmax.f32 %v4294_v60, 0.0  ;;  %v4791_v4 = vld [vmem:[#allocation15_spill] sm:$0xff] }
  0xbf   :  { %2941 = vmatmul.mubr.msk.f32.gmra.mrb[2].mxu1 %vm4140_vm1, %v923_v12  ;;  %3590 = vmatprep.subr.bf16.mxu1 %v3589_v28  ;;  %v927_v12 = vrot.slane %v4773_v52, 7  ;;  %v3597_v36 = vpack.c.bf16 %v2106_v53, %v2105_v9  ;;  %v4782_v29 = vmax.f32 %v4059_v44, 0.0  ;;  %v2111_v53 = vld [vmem:[#allocation7 + $0x60] sm:$0xff]  ;;  %v4784_v60 = vmax.f32 %v4309_v38, 0.0  ;;  %v2113_v38 = vld [vmem:[#allocation7 + $0x70] sm:$0xff] }
  0xc0   :  { %3165 = vmatmul.mubr.f32.gmra.mrb[2].mxu0 %v4771_v51  ;;  %2943 = vmatprep.mubr.msk.f32.mxu1 %vm4140_vm1, %v924_v23  ;;  %v928_v23 = vrot.slane %v4774_v37, 7  ;;  %v931_v13 = vrot.slane %v4780_v35, 7  ;;  %v1880_v51 = vld [vmem:[#allocation5 + $0x468] sm:$0xff]  ;;  %v932_v9 = vrot.slane %v4781_v22, 7  ;;  %v4785_v48 = vmax.f32 %v4323_v43, 0.0  ;;  %v2097_v41 = vld [vmem:[#allocation2 + $0x1c0] sm:$0xff] }
  0xc1   :  { %3560 = vmatpush3.bf16.msra.mxu0 %v3557_v18  ;;  %3167 = vmatprep.mubr.f32.mxu0 %v4772_v61  ;;  %v4775_v18 = vmax.f32 %v4028_v57, 0.0  ;;  %v2112_v61 = vld [vmem:[#allocation7 + $0x68] sm:$0xff]  ;;  %v4786_v37 = vmax.f32 %v4076_v11, 0.0  ;;  %v4788_v43 = vmax.f32 %v4336_v50, 0.0  ;;  %v2085_v50 = vld [vmem:[#allocation2 + $0x40] sm:$0xff] }
  0xc2   :  { %3592 = vmatpush3.bf16.msra.mxu1 %v3589_v28  ;;  %3562 = vmatprep.subr.bf16.mxu0 %v3561_v58  ;;  %v2107_v28 = vld [vmem:[#allocation7 + $0x40] sm:$0xff]  ;;  %v3609_v44 = vpack.c.bf16 %v2112_v61, %v2111_v53 }
  0xc3   :  { %2944 = vmatmul.mubr.msk.f32.gmra.mrb[4].mxu1 %vm4140_vm1, %v925_v32  ;;  %3594 = vmatprep.subr.bf16.mxu1 %v3593_v14  ;;  %v3601_v57 = vpack.c.bf16 %v2108_v21, %v2107_v28  ;;  %v930_v32 = vrot.slane %v4778_v31, 7  ;;  %v935_v28 = vrot.slane %v4788_v43, 7  ;;  %v4789_v21 = vmax.f32 %v4095_v47, 0.0  ;;  %v2084_v47 = vld [vmem:[#allocation2 + $0x20] sm:$0xff] }
  0xc4   :  { %3168 = vmatmul.mubr.f32.gmra.mrb[4].mxu0 %v4775_v18  ;;  %2946 = vmatprep.mubr.msk.f32.mxu1 %vm4140_vm1, %v926_v54  ;;  %v1879_v54 = vld [vmem:[#allocation5 + $0x460] sm:$0xff]  ;;  %v4787_v18 = vmax.f32 %v4085_v27, 0.0  ;;  %v4790_v27 = vmax.f32 %v4104_v62, 0.0 }
  0xc5   :  { %3564 = vmatpush3.bf16.msra.mxu0 %v3561_v58  ;;  %3170 = vmatprep.mubr.f32.mxu0 %v4776_v1  ;;  %v2110_v58 = vld [vmem:[#allocation7 + $0x58] sm:$0xff]  ;;  %v3577_v52 = vpack.c.bf16 %v1880_v51, %v1879_v54  ;;  %v2083_v1 = vld [vmem:[#allocation2] sm:$0xff] }
  0xc6   :  { %3596 = vmatpush3.bf16.msra.mxu1 %v3593_v14  ;;  %3566 = vmatprep.subr.bf16.mxu0 %v3565_v8  ;;  %v229_v14 = vld [vmem:[#allocation2 + $0x1f0] sm:$0xff]  ;;  %v3605_v49 = vpack.c.bf16 %v2110_v58, %v2109_v3  ;;  %v2086_v62 = vld [vmem:[#allocation2 + $0x60] sm:$0xff] }
  0xc7   :  { %2947 = vmatmul.mubr.msk.f32.gmra.mrb[6].mxu1 %vm4140_vm1, %v927_v12  ;;  %3598 = vmatprep.subr.bf16.mxu1 %v3597_v36  ;;  %v245_v15 = vmul.f32 %v4369_v0, %v229_v14  ;;  %v933_v12 = vrot.slane %v4784_v60, 7  ;;  %v934_v0 = vrot.slane %v4785_v48, 7  ;;  %v4599_v51 = vld [vmem:[%s4689_s6] ss:$0 sm:$0xff] }
  0xc8   :  { %3171 = vmatmul.mubr.f32.gmra.mrb[6].mxu0 %v269_v45  ;;  %2949 = vmatprep.mubr.msk.f32.mxu1 %vm4140_vm1, %v928_v23  ;;  %v2114_v23 = vld [vmem:[#allocation7 + $0x78] sm:$0xff] }
  0xc9   :  { %3568 = vmatpush3.bf16.msra.mxu0 %v3565_v8  ;;  %3173 = vmatprep.mubr.f32.mxu0 %v4779_v19  ;;  %v4783_v8 = vmax.f32 %v4068_v59, 0.0  ;;  %v261_v59 = vadd.f32 %v4385_v25, %v245_v15  ;;  %v3613_v11 = vpack.c.bf16 %v2114_v23, %v2113_v38 }
  0xca   :  { %3600 = vmatpush3.bf16.msra.mxu1 %v3597_v36  ;;  %3570 = vmatprep.subr.bf16.mxu0 %v3569_v5  ;;  %v1881_v36 = vld [vmem:[#allocation5 + $0x470] sm:$0xff] }
  0xcb   :  { %2950 = vmatmul.mubr.msk.f32.gmra.mrb[8].mxu1 %vm4140_vm1, %v929_v63  ;;  %3602 = vmatprep.subr.bf16.mxu1 %v3601_v57  ;;  %v3581_v45 = vpack.c.bf16 %v1882_v10, %v1881_v36  ;;  %v277_v25 = vmax.f32 %v261_v59, 0.0  ;;  %v2089_v63 = vld [vmem:[#allocation2 + $0xc0] sm:$0xff] }
  0xcc   :  { %3174 = vmatmul.mubr.f32.gmra.mrb[8].mxu0 %v4782_v29  ;;  %2952 = vmatprep.mubr.msk.f32.mxu1 %vm4140_vm1, %v930_v32 }
  0xcd   :  { %3572 = vmatpush3.bf16.msra.mxu0 %v3569_v5  ;;  %3176 = vmatprep.mubr.f32.mxu0 %v4783_v8  ;;  %v2087_v5 = vld [vmem:[#allocation2 + $0x80] sm:$0xff] }
  0xce   :  { %3604 = vmatpush3.bf16.msra.mxu1 %v3601_v57  ;;  %3574 = vmatprep.subr.bf16.mxu0 %v3573_v30  ;;  %v2092_v57 = vld [vmem:[#allocation2 + $0x120] sm:$0xff] }
  0xcf   :  { %2953 = vmatmul.mubr.msk.f32.gmra.mrb[10].mxu1 %vm4140_vm1, %v931_v13  ;;  %3606 = vmatprep.subr.bf16.mxu1 %v3605_v49 }
  0xd0   :  { %3177 = vmatmul.mubr.f32.gmra.mrb[10].mxu0 %v4786_v37  ;;  %2955 = vmatprep.mubr.msk.f32.mxu1 %vm4140_vm1, %v932_v9  ;;  %v4604_v9 = vld [vmem:[%s4687_s4] ss:$0 sm:$0xff]  ;;  %s3883_s4 = smov [#allocation9]  }
  0xd1   :  { %3576 = vmatpush3.bf16.msra.mxu0 %v3573_v30  ;;  %3179 = vmatprep.mubr.f32.mxu0 %v4787_v18  ;;  %s2300_s6 = sshll.u32 %s3883_s4, 4  ;;  %s2301_s6 = int_to_ptr.vmem [resolvable:$true] %s2300_s6 }
  0xd2   :  { %3608 = vmatpush3.bf16.msra.mxu1 %v3605_v49  ;;  %3578 = vmatprep.subr.bf16.mxu0 %v3577_v52  ;;  %s3823_s11 = scalar_lea.vmem %s2301_s6, 2048  ;;  %p3828_p11 = scmp.lt.s32.totalorder %s2301_s6, %s2301_s6 }
  0xd3   :  { %2956 = vmatmul.mubr.msk.f32.gmra.mrb[12].mxu1 %vm4140_vm1, %v933_v12  ;;  %3610 = vmatprep.subr.bf16.mxu1 %v3609_v44  ;;  %p3824_p10 = scmp.ne.s32.totalorder %s2301_s6, %s3823_s11  ;;  %p3829_p12 = scmp.lt.s32.totalorder %s3823_s11, %s3823_s11 }
  0xd4   :  { %3180 = vmatmul.mubr.f32.gmra.mrb[12].mxu0 %v4789_v21  ;;  %2958 = vmatprep.mubr.msk.f32.mxu1 %vm4140_vm1, %v934_v0 }
  0xd5   :  { %3580 = vmatpush3.bf16.msra.mxu0 %v3577_v52  ;;  %3182 = vmatprep.mubr.f32.mxu0 %v4790_v27  ;;  %p3830_p13 = por %p3829_p12, %p3828_p11 }
  0xd6   :  { %3612 = vmatpush3.bf16.msra.mxu1 %v3609_v44  ;;  %3582 = vmatprep.subr.bf16.mxu0 %v3581_v45 }
  0xd7   :  { %2959 = vmatmul.mubr.msk.f32.gmra.mrb[14].mxu1 %vm4140_vm1, %v935_v28  ;;  %3614 = vmatprep.subr.bf16.mxu1 %v3613_v11  ;;  %p3831_p0 = pnand %p3830_p13, %p3824_p10 }
  0xd8   :  { %3183 = vmatmul.mubr.f32.gmra.mrb[14].mxu0 %v277_v25  ;;  %3273 = vmatprep.mubr.f32.mxu1 %v2083_v1 }
  0xd9   :  { %3584 = vmatpush3.bf16.msra.mxu0 %v3581_v45  ;;  %3217 = vmatprep.mubr.f32.mxu0 %v4122_v39  ;;  %v2090_v39 = vld [vmem:[#allocation2 + $0xe0] sm:$0xff] }
  0xda   :  { %3616 = vmatpush3.bf16.msra.mxu1 %v3613_v11 }
  0xdc   :  { %3218 = vmatmul.mubr.f32.vlgmr.msra.gmra.mrb[0].mxu0 %v4135_v2  ;;  %v2091_v2 = vld [vmem:[#allocation2 + $0x100] sm:$0xff] }
  0xdd   :  { %3274 = vmatmul.mubr.f32.vlgmr.msra.gmra.mrb[16].mxu1 %v2084_v47  ;;  %3220 = vmatprep.mubr.f32.mxu0 %v4152_v24  ;;  %v4792_v24 = vmax.f32 %v4388_v55, 0.0  ;;  %v2096_v55 = vld [vmem:[#allocation2 + $0x1a0] sm:$0xff] }
  0xde   :  { %3276 = vmatprep.mubr.f32.mxu1 %v2085_v50 }
  0xe0   :  { %3221 = vmatmul.mubr.f32.gmra.mrb[2].mxu0 %v4791_v4 }
  0xe1   :  { %3277 = vmatmul.mubr.f32.gmra.mrb[18].mxu1 %v2086_v62  ;;  %3223 = vmatprep.mubr.f32.mxu0 %v4180_v6  ;;  %v2093_v6 = vld [vmem:[#allocation2 + $0x140] sm:$0xff] }
  0xe2   :  { %3279 = vmatprep.mubr.f32.mxu1 %v2087_v5 }
  0xe4   :  { %3224 = vmatmul.mubr.f32.gmra.mrb[4].mxu0 %v4196_v26  ;;  %v2094_v26 = vld [vmem:[#allocation2 + $0x160] sm:$0xff] }
  0xe5   :  { %3280 = vmatmul.mubr.f32.gmra.mrb[20].mxu1 %v2088_v7  ;;  %3226 = vmatprep.mubr.f32.mxu0 %v4211_v46  ;;  %v2095_v46 = vld [vmem:[#allocation2 + $0x180] sm:$0xff] }
  0xe6   :  { %3282 = vmatprep.mubr.f32.mxu1 %v2089_v63 }
  0xe8   :  { %3227 = vmatmul.mubr.f32.gmra.mrb[6].mxu0 %v4792_v24 }
  0xe9   :  { %3283 = vmatmul.mubr.f32.gmra.mrb[22].mxu1 %v2090_v39  ;;  %3229 = vmatprep.mubr.f32.mxu0 %v4241_v16  ;;  %v2098_v16 = vld [vmem:[#allocation2 + $0x1e0] sm:$0xff] }
  0xea   :  { %3285 = vmatprep.mubr.f32.mxu1 %v2091_v2 }
  0xec   :  { %3230 = vmatmul.mubr.f32.gmra.mrb[8].mxu0 %v4256_v20  ;;  %v4793_v20 = vld [vmem:[#allocation16_spill] sm:$0xff] }
  0xed   :  { %3286 = vmatmul.mubr.f32.gmra.mrb[24].mxu1 %v2092_v57  ;;  %3232 = vmatprep.mubr.f32.mxu0 %v4272_v40  ;;  %v4794_v40 = vmax.f32 %v4793_v20, 0.0 }
  0xee   :  { %3288 = vmatprep.mubr.f32.mxu1 %v2093_v6 }
  0xf0   :  { %3233 = vmatmul.mubr.f32.gmra.mrb[10].mxu0 %v4287_v42 }
  0xf1   :  { %3289 = vmatmul.mubr.f32.gmra.mrb[26].mxu1 %v2094_v26  ;;  %3235 = vmatprep.mubr.f32.mxu0 %v4302_v33 }
  0xf2   :  { %3291 = vmatprep.mubr.f32.mxu1 %v2095_v46 }
  0xf4   :  { %3236 = vmatmul.mubr.f32.gmra.mrb[12].mxu0 %v4317_v56 }
  0xf5   :  { %3292 = vmatmul.mubr.f32.gmra.mrb[28].mxu1 %v2096_v55  ;;  %3238 = vmatprep.mubr.f32.mxu0 %v4330_v17 }
  0xf6   :  { %3294 = vmatprep.mubr.f32.mxu1 %v2097_v41 }
  0xf8   :  { %3239 = vmatmul.mubr.f32.gmra.mrb[14].mxu0 %v4794_v40 }
  0xf9   :  { %3295 = vmatmul.mubr.f32.gmra.mrb[30].mxu1 %v2098_v16 }
 0x18e   :  { %v2939_v34 = vpop.f32.mrb[0].mxu1 }
 0x18f   :  { %v1051_v31 = vpop.f32.mrb[1].mxu1 }
 0x192   :  { %v2942_v42 = vpop.f32.mrb[2].mxu1 }
 0x193   :  { %v1061_v32 = vpop.f32.mrb[3].mxu1 }
 0x196   :  { %v2945_v3 = vpop.f32.mrb[4].mxu1 }
 0x197   :  { %v1071_v33 = vpop.f32.mrb[5].mxu1 }
 0x19a   :  { %v2948_v58 = vpop.f32.mrb[6].mxu1 }
 0x19b   :  { %v1081_v19 = vpop.f32.mrb[7].mxu1 }
 0x19e   :  { %v4580_v14 = vpop.f32.mrb[8].mxu1 }
 0x19f   :  { %v4582_v56 = vpop.f32.mrb[9].mxu1 }
 0x1a2   :  { %v4584_v30 = vpop.f32.mrb[10].mxu1 }
 0x1a3   :  { %v4586_v17 = vpop.f32.mrb[11].mxu1 }
 0x1a6   :  { %v4588_v35 = vpop.f32.mrb[12].mxu1 }
 0x1a7   :  { %v4590_v13 = vpop.f32.mrb[13].mxu1 }
 0x1aa   :  { %v4592_v49 = vpop.f32.mrb[14].mxu1 }
 0x1ab   :  { %v4594_v54 = vpop.f32.mrb[15].mxu1 }
 0x1af   :  { %v3219_v22 = vpop.f32.mrb[0].mxu0 }
 0x1b0   :  { %v3617_v29 = vadd.f32 %v3219_v22, %v2939_v34  ;;  %v1949_v53 = vpop.f32.mrb[1].mxu0  ;;  %v3275_v61 = vpop.f32.mrb[16].mxu1 }
 0x1b1   :  { %v3618_v15 = vadd.f32 %v1949_v53, %v1051_v31  ;;  %v2194_v8 = vadd.f32 %v3275_v61, %v4599_v51  ;;  %v2188_v52 = vpop.f32.mrb[17].mxu1 }
 0x1b2   :  { %v2052_v60 = vadd.f32 %v3617_v29, %v4604_v9  ;;  %v2189_v12 = vadd.f32 %v4599_v51, %v2188_v52 }
 0x1b3   :  { %v2051_v44 = vadd.f32 %v3618_v15, %v4604_v9  ;;  %2268 = vst [vmem:[#allocation9 + $0x8] sm:$0xff] %v2194_v8  ;;  %v3222_v36 = vpop.f32.mrb[2].mxu0 }
 0x1b4   :  { %2068 = vst [vmem:[#allocation8 + $0x8] sm:$0xff] %v2052_v60  ;;  %2267 = vst [vmem:[#allocation9] sm:$0xff] %v2189_v12  ;;  %v3619_v10 = vadd.f32 %v3222_v36, %v2942_v42  ;;  %v1959_v48 = vpop.f32.mrb[3].mxu0  ;;  %v3278_v0 = vpop.f32.mrb[18].mxu1 }
 0x1b5   :  { %2067 = vst [vmem:[#allocation8] sm:$0xff] %v2051_v44  ;;  %v3620_v37 = vadd.f32 %v1959_v48, %v1061_v32  ;;  %v2204_v59 = vadd.f32 %v3278_v0, %v4599_v51  ;;  %v2198_v38 = vpop.f32.mrb[19].mxu1 }
 0x1b6   :  { %v2054_v23 = vadd.f32 %v3619_v10, %v4604_v9  ;;  %v2199_v18 = vadd.f32 %v4599_v51, %v2198_v38 }
 0x1b7   :  { %v2053_v45 = vadd.f32 %v3620_v37, %v4604_v9  ;;  %2270 = vst [vmem:[#allocation9 + $0x18] sm:$0xff] %v2204_v59  ;;  %v3225_v43 = vpop.f32.mrb[4].mxu0 }
 0x1b8   :  { %2070 = vst [vmem:[#allocation8 + $0x18] sm:$0xff] %v2054_v23  ;;  %2269 = vst [vmem:[#allocation9 + $0x10] sm:$0xff] %v2199_v18  ;;  %v3621_v28 = vadd.f32 %v3225_v43, %v2945_v3  ;;  %v1969_v11 = vpop.f32.mrb[5].mxu0  ;;  %v3281_v21 = vpop.f32.mrb[20].mxu1 }
 0x1b9   :  { %2069 = vst [vmem:[#allocation8 + $0x10] sm:$0xff] %v2053_v45  ;;  %v3622_v25 = vadd.f32 %v1969_v11, %v1071_v33  ;;  %v2214_v27 = vadd.f32 %v3281_v21, %v4599_v51  ;;  %v2208_v1 = vpop.f32.mrb[21].mxu1 }
 0x1ba   :  { %v2056_v47 = vadd.f32 %v3621_v28, %v4604_v9  ;;  %v2209_v50 = vadd.f32 %v4599_v51, %v2208_v1 }
 0x1bb   :  { %v2055_v62 = vadd.f32 %v3622_v25, %v4604_v9  ;;  %2272 = vst [vmem:[#allocation9 + $0x28] sm:$0xff] %v2214_v27  ;;  %v3228_v5 = vpop.f32.mrb[6].mxu0 }
 0x1bc   :  { %2072 = vst [vmem:[#allocation8 + $0x28] sm:$0xff] %v2056_v47  ;;  %2271 = vst [vmem:[#allocation9 + $0x20] sm:$0xff] %v2209_v50  ;;  %v3623_v4 = vadd.f32 %v3228_v5, %v2948_v58  ;;  %v1979_v7 = vpop.f32.mrb[7].mxu0  ;;  %v3284_v63 = vpop.f32.mrb[22].mxu1 }
 0x1bd   :  { %2071 = vst [vmem:[#allocation8 + $0x20] sm:$0xff] %v2055_v62  ;;  %v3624_v39 = vadd.f32 %v1979_v7, %v1081_v19  ;;  %v2224_v2 = vadd.f32 %v3284_v63, %v4599_v51  ;;  %v2218_v24 = vpop.f32.mrb[23].mxu1 }
 0x1be   :  { %v2058_v57 = vadd.f32 %v3623_v4, %v4604_v9  ;;  %v2219_v6 = vadd.f32 %v4599_v51, %v2218_v24 }
 0x1bf   :  { %v2057_v26 = vadd.f32 %v3624_v39, %v4604_v9  ;;  %2274 = vst [vmem:[#allocation9 + $0x38] sm:$0xff] %v2224_v2  ;;  %v3231_v46 = vpop.f32.mrb[8].mxu0 }
 0x1c0   :  { %2074 = vst [vmem:[#allocation8 + $0x38] sm:$0xff] %v2058_v57  ;;  %2273 = vst [vmem:[#allocation9 + $0x30] sm:$0xff] %v2219_v6  ;;  %v3625_v55 = vadd.f32 %v3231_v46, %v4580_v14  ;;  %v1989_v41 = vpop.f32.mrb[9].mxu0  ;;  %v3287_v16 = vpop.f32.mrb[24].mxu1 }
 0x1c1   :  { %2073 = vst [vmem:[#allocation8 + $0x30] sm:$0xff] %v2057_v26  ;;  %v3626_v20 = vadd.f32 %v1989_v41, %v4582_v56  ;;  %v2234_v40 = vadd.f32 %v3287_v16, %v4599_v51  ;;  %v2228_v34 = vpop.f32.mrb[25].mxu1 }
 0x1c2   :  { %v2060_v31 = vadd.f32 %v3625_v55, %v4604_v9  ;;  %v2229_v42 = vadd.f32 %v4599_v51, %v2228_v34 }
 0x1c3   :  { %v2059_v32 = vadd.f32 %v3626_v20, %v4604_v9  ;;  %2276 = vst [vmem:[#allocation9 + $0x48] sm:$0xff] %v2234_v40  ;;  %v3234_v3 = vpop.f32.mrb[10].mxu0 }
 0x1c4   :  { %2076 = vst [vmem:[#allocation8 + $0x48] sm:$0xff] %v2060_v31  ;;  %2275 = vst [vmem:[#allocation9 + $0x40] sm:$0xff] %v2229_v42  ;;  %v3627_v33 = vadd.f32 %v3234_v3, %v4584_v30  ;;  %v1999_v58 = vpop.f32.mrb[11].mxu0  ;;  %v3290_v19 = vpop.f32.mrb[26].mxu1 }
 0x1c5   :  { %2075 = vst [vmem:[#allocation8 + $0x40] sm:$0xff] %v2059_v32  ;;  %v3628_v14 = vadd.f32 %v1999_v58, %v4586_v17  ;;  %v2244_v56 = vadd.f32 %v3290_v19, %v4599_v51  ;;  %v2238_v22 = vpop.f32.mrb[27].mxu1 }
 0x1c6   :  { %v2062_v29 = vadd.f32 %v3627_v33, %v4604_v9  ;;  %v2239_v53 = vadd.f32 %v4599_v51, %v2238_v22 }
 0x1c7   :  { %v2061_v61 = vadd.f32 %v3628_v14, %v4604_v9  ;;  %2278 = vst [vmem:[#allocation9 + $0x58] sm:$0xff] %v2244_v56  ;;  %v3237_v15 = vpop.f32.mrb[12].mxu0 }
 0x1c8   :  { %2078 = vst [vmem:[#allocation8 + $0x58] sm:$0xff] %v2062_v29  ;;  %2277 = vst [vmem:[#allocation9 + $0x50] sm:$0xff] %v2239_v53  ;;  %v3629_v30 = vadd.f32 %v3237_v15, %v4588_v35  ;;  %v2009_v8 = vpop.f32.mrb[13].mxu0  ;;  %v3293_v52 = vpop.f32.mrb[28].mxu1 }
 0x1c9   :  { %2077 = vst [vmem:[#allocation8 + $0x50] sm:$0xff] %v2061_v61  ;;  %v3630_v17 = vadd.f32 %v2009_v8, %v4590_v13  ;;  %v2254_v60 = vadd.f32 %v3293_v52, %v4599_v51  ;;  %v2248_v12 = vpop.f32.mrb[29].mxu1 }
 0x1ca   :  { %v2064_v44 = vadd.f32 %v3629_v30, %v4604_v9  ;;  %v2249_v36 = vadd.f32 %v4599_v51, %v2248_v12 }
 0x1cb   :  { %v2063_v10 = vadd.f32 %v3630_v17, %v4604_v9  ;;  %2280 = vst [vmem:[#allocation9 + $0x68] sm:$0xff] %v2254_v60  ;;  %v3240_v48 = vpop.f32.mrb[14].mxu0 }
 0x1cc   :  { %2080 = vst [vmem:[#allocation8 + $0x68] sm:$0xff] %v2064_v44  ;;  %2279 = vst [vmem:[#allocation9 + $0x60] sm:$0xff] %v2249_v36  ;;  %v3631_v35 = vadd.f32 %v3240_v48, %v4592_v49  ;;  %v2019_v0 = vpop.f32.mrb[15].mxu0  ;;  %v3296_v37 = vpop.f32.mrb[30].mxu1 }
 0x1cd   :  { %2079 = vst [vmem:[#allocation8 + $0x60] sm:$0xff] %v2063_v10  ;;  %v3632_v13 = vadd.f32 %v2019_v0, %v4594_v54  ;;  %v2264_v59 = vadd.f32 %v3296_v37, %v4599_v51  ;;  %v2258_v38 = vpop.f32.mrb[31].mxu1 }
 0x1ce   :  { %v2066_v23 = vadd.f32 %v3631_v35, %v4604_v9  ;;  %v2259_v18 = vadd.f32 %v4599_v51, %v2258_v38 }
 0x1cf   :  { %v2065_v45 = vadd.f32 %v3632_v13, %v4604_v9  ;;  %2282 = vst [vmem:[#allocation9 + $0x78] sm:$0xff] %v2264_v59 }
 0x1d0   :  { %2082 = vst [vmem:[#allocation8 + $0x78] sm:$0xff] %v2066_v23  ;;  %2281 = vst [vmem:[#allocation9 + $0x70] sm:$0xff] %v2259_v18 }
 0x1d1   :  { %2081 = vst [vmem:[#allocation8 + $0x70] sm:$0xff] %v2065_v45 }
 0x1d2   :  { %3834 = shalt.err (!%p3831_p0)
}
 0x1d3   :  { %s3835_s14 = scalar_lea.hbm %s4691_s8, 2048 }
 0x1d4   :  { %p3836_p1 = scmp.ne.s32.totalorder %s4691_s8, %s3835_s14  ;;  %p3839_p2 = scmp.lt.u32.totalorder %s3835_s14, %s4691_s8 }
 0x1d6   :  { %p3841_p3 = pnand %p3839_p2, %p3836_p1 }
 0x1d8   :  { %3844 = shalt.err (!%p3841_p3)
}
 0x1d9   :  { %2306 = dma.vmem_to_hbm [thread:$0]  %s2301_s6, 2048, %s4691_s8, [#allocation10], %s3876_s15, %s3876_s15, %s3877_s16  }
 0x1da   :  { %s3845_s20 = scalar_lea.vmem %s4646_s10, 2048  ;;  %p3850_p5 = scmp.lt.s32.totalorder %s4646_s10, %s4646_s10 }
 0x1db   :  { %p3846_p4 = scmp.ne.s32.totalorder %s4646_s10, %s3845_s20  ;;  %p3851_p6 = scmp.lt.s32.totalorder %s3845_s20, %s3845_s20 }
 0x1dd   :  { %p3852_p7 = por %p3851_p6, %p3850_p5 }
 0x1df   :  { %p3853_p8 = pnand %p3852_p7, %p3846_p4 }
 0x1e1   :  { %3856 = shalt.err (!%p3853_p8)
}
 0x1e2   :  { %s3857_s24 = scalar_lea.hbm %s4690_s7, 2048 }
 0x1e3   :  { %p3858_p9 = scmp.ne.s32.totalorder %s4690_s7, %s3857_s24  ;;  %p3861_p10 = scmp.lt.u32.totalorder %s3857_s24, %s4690_s7 }
 0x1e5   :  { %p3863_p11 = pnand %p3861_p10, %p3858_p9 }
 0x1e7   :  { %3866 = shalt.err (!%p3863_p11)
}
 0x1e8   :  { %2294 = dma.vmem_to_hbm [thread:$0]  %s4646_s10, 2048, %s4690_s7, [#allocation4], %s3876_s15, %s3876_s15, %s3877_s16  }
 0x1e9   :  { %3871 = dma.done.wait [#allocation4], 2048  }
 0x1ea   :  { %3872 = vsyncadd [#allocation4], 4294965248 }
 0x1eb   :  { %3873 = dma.done.wait [#allocation10], 2048  }
 0x1ec   :  { %3874 = vsyncadd [#allocation10], 4294965248 }
 0x1ed   :  { %2313 = vsyncpa [#allocation3], 1 }
 0x1ee   :  { %2314 = vsyncpa [#allocation6], 1 }
 0x1ef   :  { %2315 = vsyncpa [#allocation4], 1 }
 0x1f0   :  { %2316 = vsyncpa [#allocation10], 1 }

</bundles_post_ra>
